<compile_context>
chip_gen: v5e
topology: v5e:2x2
jax: 0.10.0
libtpu: 0.0.40
codegen_flags: <defaults>
</compile_context>

<pallas_src>
import math
from functools import partial

import jax
import jax.numpy as jnp
from jax.experimental import pallas as pl
from jax.experimental.pallas import tpu as pltpu


def _pick_vmem_limit():
    # v7x has 64 MiB VMEM per TensorCore -> stay <= 48 MiB; v5e/v6e have 128 MiB -> 96 MiB.
    try:
        info = pltpu.get_tpu_info()
        cap = getattr(info, "vmem_capacity_bytes", 128 * 1024 * 1024)
        if cap <= 64 * 1024 * 1024:
            return 48 * 1024 * 1024
        return 96 * 1024 * 1024
    except Exception:
        return 48 * 1024 * 1024


VMEM_LIMIT = _pick_vmem_limit()


# ----------------------------- Pallas kernels -----------------------------

def encoder_layer_kernel(x_ref, pe_ref, wqkv_ref, bqkv_ref, wo_ref, bo_ref,
                         ln1_g_ref, ln1_b_ref,
                         w1_ref, b1_ref, w2_ref, b2_ref,
                         ln2_g_ref, ln2_b_ref,
                         o_ref, *, n_head, add_pos, in_scale, eps=1e-5):
    # Fused torch TransformerEncoderLayer (post-norm, relu) for one batch element.
    # x:(1,S,E); weights bf16 pre-transposed to (in,out); biases / LN params f32.
    S = x_ref.shape[1]
    E = x_ref.shape[2]
    H = n_head
    Dh = E // H
    scale = 1.0 / math.sqrt(Dh)

    x = x_ref[0].astype(jnp.float32)                                      # (S, E) f32
    if add_pos:
        # embedding * sqrt(E) + positional encoding (dropout == identity in eval)
        x = x * in_scale + pe_ref[...]

    # ---- fused QKV projection (bf16 MXU, f32 accumulate) ----
    qkv = jnp.dot(x.astype(jnp.bfloat16), wqkv_ref[...],
                  preferred_element_type=jnp.float32) + bqkv_ref[...]     # (S, 3E) f32

    # ---- batched-head causal self-attention ----
    # Stack heads along a new leading (batch) axis -> (H, S, Dh); no lane reshapes.
    q = jnp.stack([qkv[:, h * Dh:(h + 1) * Dh] for h in range(H)], axis=0) * scale
    k = jnp.stack([qkv[:, E + h * Dh:E + (h + 1) * Dh] for h in range(H)], axis=0)
    v = jnp.stack([qkv[:, 2 * E + h * Dh:2 * E + (h + 1) * Dh] for h in range(H)], axis=0)

    s = jax.lax.dot_general(q.astype(jnp.bfloat16), k.astype(jnp.bfloat16),
                            (((2,), (2,)), ((0,), (0,))),
                            preferred_element_type=jnp.float32)           # (H, S, S) f32

    row = jax.lax.broadcasted_iota(jnp.int32, (H, S, S), 1)
    col = jax.lax.broadcasted_iota(jnp.int32, (H, S, S), 2)
    # -inf is safe: the causal diagonal is always unmasked (no fully-masked rows).
    s = jnp.where(col <= row, s, -jnp.inf)

    m = jnp.max(s, axis=-1, keepdims=True)
    p = jnp.exp(s - m)
    denom = jnp.sum(p, axis=-1, keepdims=True)
    p = p * pl.reciprocal(denom, approx=True)                             # EUP slot

    o = jax.lax.dot_general(p.astype(jnp.bfloat16), v.astype(jnp.bfloat16),
                            (((2,), (1,)), ((0,), (0,))),
                            preferred_element_type=jnp.float32)           # (H, S, Dh) f32

    # heads -> lane-dense (S, E), then ONE out-projection with full K=E depth
    o_cat = jnp.concatenate([o[h] for h in range(H)], axis=-1)            # (S, E) f32
    attn_out = jnp.dot(o_cat.astype(jnp.bfloat16), wo_ref[...],
                       preferred_element_type=jnp.float32) + bo_ref[...]  # (S, E) f32

    # ---- residual + LayerNorm1 (f32) ----
    y = x + attn_out
    mu = jnp.mean(y, axis=-1, keepdims=True)
    var = jnp.mean((y - mu) ** 2, axis=-1, keepdims=True)
    y = (y - mu) * jax.lax.rsqrt(var + eps) * ln1_g_ref[...] + ln1_b_ref[...]

    # ---- feed-forward: relu(y @ w1 + b1) @ w2 + b2 ----
    hdn = jnp.dot(y.astype(jnp.bfloat16), w1_ref[...],
                  preferred_element_type=jnp.float32) + b1_ref[...]
    hdn = jnp.maximum(hdn, 0.0)
    ff = jnp.dot(hdn.astype(jnp.bfloat16), w2_ref[...],
                 preferred_element_type=jnp.float32) + b2_ref[...]

    # ---- residual + LayerNorm2 (f32) ----
    z = y + ff
    mu2 = jnp.mean(z, axis=-1, keepdims=True)
    var2 = jnp.mean((z - mu2) ** 2, axis=-1, keepdims=True)
    z = (z - mu2) * jax.lax.rsqrt(var2 + eps) * ln2_g_ref[...] + ln2_b_ref[...]

    o_ref[0] = z.astype(o_ref.dtype)                                      # bf16 out


def decoder_kernel(x_ref, w_ref, b_ref, o_ref):
    # x:(tm,E) bf16, w:(E,tn) bf16, b:(1,tn) f32 -> o:(tm,tn) f32
    acc = jnp.dot(x_ref[...].astype(jnp.bfloat16), w_ref[...],
                  preferred_element_type=jnp.float32)
    o_ref[...] = (acc + b_ref[...]).astype(o_ref.dtype)


# ----------------------------- pallas_call wrappers -----------------------------

def _pick_tile(dim, candidates):
    # largest candidate that evenly divides `dim`; otherwise use the full dim
    # (a full dim is always a legal TPU block size).
    for t in candidates:
        if t <= dim and dim % t == 0:
            return t
    return dim


def encoder_layer(x, pe, layer, n_head, add_pos, in_scale):
    B, S, E = x.shape
    Hid = layer["w1"].shape[1]
    return pl.pallas_call(
        partial(encoder_layer_kernel, n_head=n_head, add_pos=add_pos, in_scale=in_scale),
        grid=(B,),
        in_specs=[
            pl.BlockSpec((1, S, E), lambda b: (b, 0, 0)),   # x
            pl.BlockSpec((S, E), lambda b: (0, 0)),         # pe
            pl.BlockSpec((E, 3 * E), lambda b: (0, 0)),     # wqkv (pre-transposed)
            pl.BlockSpec((1, 3 * E), lambda b: (0, 0)),     # bqkv
            pl.BlockSpec((E, E), lambda b: (0, 0)),         # wo
            pl.BlockSpec((1, E), lambda b: (0, 0)),         # bo
            pl.BlockSpec((1, E), lambda b: (0, 0)),         # ln1_g
            pl.BlockSpec((1, E), lambda b: (0, 0)),         # ln1_b
            pl.BlockSpec((E, Hid), lambda b: (0, 0)),       # w1
            pl.BlockSpec((1, Hid), lambda b: (0, 0)),       # b1
            pl.BlockSpec((Hid, E), lambda b: (0, 0)),       # w2
            pl.BlockSpec((1, E), lambda b: (0, 0)),         # b2
            pl.BlockSpec((1, E), lambda b: (0, 0)),         # ln2_g
            pl.BlockSpec((1, E), lambda b: (0, 0)),         # ln2_b
        ],
        out_specs=pl.BlockSpec((1, S, E), lambda b: (b, 0, 0)),
        out_shape=jax.ShapeDtypeStruct((B, S, E), jnp.bfloat16),          # bf16 activations
        compiler_params=pltpu.CompilerParams(
            dimension_semantics=("parallel",),
            vmem_limit_bytes=VMEM_LIMIT),
    )(x, pe, layer["wqkv"], layer["bqkv"], layer["wo"], layer["bo"],
      layer["ln1_g"], layer["ln1_b"],
      layer["w1"], layer["b1"], layer["w2"], layer["b2"],
      layer["ln2_g"], layer["ln2_b"])


def decoder_matmul(x2d, w_t_bf16, b_row):
    # Weight-resident tiling: grid = (vocab tiles, row tiles); the (E,tn) weight tile
    # index depends only on the outer axis, so it stays in VMEM while x tiles stream.
    M, E = x2d.shape
    Vp = w_t_bf16.shape[1]                      # vocab padded to a multiple of 128
    tm = _pick_tile(M, (1024, 512, 256, 128, 64, 32, 16, 8))
    tn = _pick_tile(Vp, (2048, 1024, 512, 256, 128))
    return pl.pallas_call(
        decoder_kernel,
        grid=(Vp // tn, M // tm),
        in_specs=[
            pl.BlockSpec((tm, E), lambda n, m: (m, 0)),
            pl.BlockSpec((E, tn), lambda n, m: (0, n)),     # resident across inner axis
            pl.BlockSpec((1, tn), lambda n, m: (0, n)),
        ],
        out_specs=pl.BlockSpec((tm, tn), lambda n, m: (m, n)),
        out_shape=jax.ShapeDtypeStruct((M, Vp), jnp.float32),
        compiler_params=pltpu.CompilerParams(
            dimension_semantics=("parallel", "parallel"),
            vmem_limit_bytes=VMEM_LIMIT),
    )(x2d, w_t_bf16, b_row)


# ----------------------------- model glue (plain JAX) -----------------------------

def positional_encoding(S, d_model):
    position = jnp.arange(S, dtype=jnp.float32)[:, None]
    div_term = jnp.exp(jnp.arange(0, d_model, 2, dtype=jnp.float32)
                       * (-math.log(10000.0) / d_model))
    pe = jnp.zeros((S, d_model), jnp.float32)
    pe = pe.at[:, 0::2].set(jnp.sin(position * div_term))
    pe = pe.at[:, 1::2].set(jnp.cos(position * div_term))
    return pe  # (S, E)


def init_params(key, n_tokens, n_inp, n_head, n_hid, n_layers):
    E = n_inp
    V = n_tokens
    Vp = ((V + 127) // 128) * 128               # lane-dense padded vocab
    keys = jax.random.split(key, 2 + n_layers)
    dec_w = jax.random.uniform(keys[1], (V, E), jnp.float32, -0.1, 0.1)
    dec_w_p = jnp.zeros((Vp, E), jnp.float32).at[:V].set(dec_w)
    params = {
        "embedding": jax.random.uniform(keys[0], (V, E), jnp.float32, -0.1, 0.1),
        # decoder weight pre-transposed (E, Vp), bf16 for the MXU; padded cols are zero
        "dec_w_t": dec_w_p.T.astype(jnp.bfloat16),
        "dec_b": jnp.zeros((1, Vp), jnp.float32),
        "layers": [],
    }
    for l in range(n_layers):
        lk = jax.random.split(keys[2 + l], 6)
        layer = dict(
            # all weight matrices pre-transposed to (in, out) layout, bf16
            wqkv=(jax.random.normal(lk[0], (E, 3 * E)) * 0.05).astype(jnp.bfloat16),
            bqkv=(jax.random.normal(lk[1], (1, 3 * E)) * 0.02).astype(jnp.float32),
            wo=(jax.random.normal(lk[2], (E, E)) * 0.05).astype(jnp.bfloat16),
            bo=jnp.zeros((1, E), jnp.float32),
            w1=(jax.random.normal(lk[3], (E, n_hid)) * 0.05).astype(jnp.bfloat16),
            b1=(jax.random.normal(lk[4], (1, n_hid)) * 0.02).astype(jnp.float32),
            w2=(jax.random.normal(lk[5], (n_hid, E)) * 0.05).astype(jnp.bfloat16),
            b2=jnp.zeros((1, E), jnp.float32),
            ln1_g=jnp.ones((1, E), jnp.float32),
            ln1_b=jnp.zeros((1, E), jnp.float32),
            ln2_g=jnp.ones((1, E), jnp.float32),
            ln2_b=jnp.zeros((1, E), jnp.float32),
        )
        params["layers"].append(layer)
    return params


def transformer_lm_forward(params, src, n_head):
    S, B = src.shape
    V, E = params["embedding"].shape

    # TODO(synk): embedding row-gather stays as an XLA take(); a Pallas gather would
    # need scalar-prefetch pl.Element index maps which is overkill here.
    emb = jnp.take(params["embedding"], src.T, axis=0)        # (B, S, E) f32
    pe = positional_encoding(S, E)                            # (S, E) f32

    x = emb
    for li, layer in enumerate(params["layers"]):
        # first layer fuses the sqrt(E) scale + positional-encoding add
        x = encoder_layer(x, pe, layer, n_head,
                          add_pos=(li == 0), in_scale=math.sqrt(E))       # (B,S,E) bf16

    # transpose the small activations (not the big logits) to (S,B,E) before decoding
    x_sbe = x.transpose(1, 0, 2).reshape(S * B, E)            # (S*B, E) bf16
    logits_p = decoder_matmul(x_sbe, params["dec_w_t"], params["dec_b"])  # (S*B, Vp) f32
    return logits_p.reshape(S, B, -1)[:, :, :V]               # (S, B, n_tokens)


if __name__ == "__main__":
    n_tokens, n_inp, n_head, n_hid, n_layers = 50, 32, 2, 64, 2
    S, B = 8, 2

    key = jax.random.PRNGKey(0)
    pkey, skey = jax.random.split(key)
    params = init_params(pkey, n_tokens, n_inp, n_head, n_hid, n_layers)
    src = jax.random.randint(skey, (S, B), 0, n_tokens, dtype=jnp.int32)

    fwd = jax.jit(partial(transformer_lm_forward, n_head=n_head))
    out = fwd(params, src)
    out = jax.block_until_ready(out)

    assert out.shape == (S, B, n_tokens), out.shape
    assert bool(jnp.all(jnp.isfinite(out)))
    print("KERNEL_OK")
</pallas_src>

<mosaic_0001>
module attributes {stable_mosaic.version = 11 : i64} {
  func.func @encoder_layer_kernel(%arg0: i32, %arg1: memref<1x8x32xf32, #tpu.memory_space<vmem>>, %arg2: memref<8x32xf32, #tpu.memory_space<vmem>>, %arg3: memref<32x96xbf16, #tpu.memory_space<vmem>>, %arg4: memref<1x96xf32, #tpu.memory_space<vmem>>, %arg5: memref<32x32xbf16, #tpu.memory_space<vmem>>, %arg6: memref<1x32xf32, #tpu.memory_space<vmem>>, %arg7: memref<1x32xf32, #tpu.memory_space<vmem>>, %arg8: memref<1x32xf32, #tpu.memory_space<vmem>>, %arg9: memref<32x64xbf16, #tpu.memory_space<vmem>>, %arg10: memref<1x64xf32, #tpu.memory_space<vmem>>, %arg11: memref<64x32xbf16, #tpu.memory_space<vmem>>, %arg12: memref<1x32xf32, #tpu.memory_space<vmem>>, %arg13: memref<1x32xf32, #tpu.memory_space<vmem>>, %arg14: memref<1x32xf32, #tpu.memory_space<vmem>>, %arg15: memref<1x8x32xbf16, #tpu.memory_space<vmem>>) attributes {dimension_semantics = [#tpu.dimension_semantics<parallel>], iteration_bounds = array<i64: 2>, scalar_prefetch = 0 : i64, scratch_operands = 0 : i64, tpu.core_type = #tpu.core_type<tc>, window_params = [{transform_indices = @transform_0, window_bounds = array<i64: 1, 8, 32>}, {pipeline_mode = #tpu.pipeline_mode<synchronous>, transform_indices = @transform_1, window_bounds = array<i64: 8, 32>}, {pipeline_mode = #tpu.pipeline_mode<synchronous>, transform_indices = @transform_2, window_bounds = array<i64: 32, 96>}, {pipeline_mode = #tpu.pipeline_mode<synchronous>, transform_indices = @transform_3, window_bounds = array<i64: 1, 96>}, {pipeline_mode = #tpu.pipeline_mode<synchronous>, transform_indices = @transform_4, window_bounds = array<i64: 32, 32>}, {pipeline_mode = #tpu.pipeline_mode<synchronous>, transform_indices = @transform_5, window_bounds = array<i64: 1, 32>}, {pipeline_mode = #tpu.pipeline_mode<synchronous>, transform_indices = @transform_6, window_bounds = array<i64: 1, 32>}, {pipeline_mode = #tpu.pipeline_mode<synchronous>, transform_indices = @transform_7, window_bounds = array<i64: 1, 32>}, {pipeline_mode = #tpu.pipeline_mode<synchronous>, transform_indices = @transform_8, window_bounds = array<i64: 32, 64>}, {pipeline_mode = #tpu.pipeline_mode<synchronous>, transform_indices = @transform_9, window_bounds = array<i64: 1, 64>}, {pipeline_mode = #tpu.pipeline_mode<synchronous>, transform_indices = @transform_10, window_bounds = array<i64: 64, 32>}, {pipeline_mode = #tpu.pipeline_mode<synchronous>, transform_indices = @transform_11, window_bounds = array<i64: 1, 32>}, {pipeline_mode = #tpu.pipeline_mode<synchronous>, transform_indices = @transform_12, window_bounds = array<i64: 1, 32>}, {pipeline_mode = #tpu.pipeline_mode<synchronous>, transform_indices = @transform_13, window_bounds = array<i64: 1, 32>}, {transform_indices = @transform_14, window_bounds = array<i64: 1, 8, 32>}]} {
    %c0 = arith.constant 0 : index
    %c0_0 = arith.constant 0 : index
    %c0_1 = arith.constant 0 : index
    %0 = vector.load %arg1[%c0, %c0_0, %c0_1] : memref<1x8x32xf32, #tpu.memory_space<vmem>>, vector<1x8x32xf32>
    %1 = vector.shape_cast %0 : vector<1x8x32xf32> to vector<8x32xf32>
    %cst = arith.constant 5.65685415 : f32
    %2 = vector.broadcast %cst : f32 to vector<8x32xf32>
    %3 = arith.mulf %1, %2 : vector<8x32xf32>
    %c0_2 = arith.constant 0 : index
    %c0_3 = arith.constant 0 : index
    %4 = vector.load %arg2[%c0_2, %c0_3] : memref<8x32xf32, #tpu.memory_space<vmem>>, vector<8x32xf32>
    %5 = arith.addf %3, %4 : vector<8x32xf32>
    %6 = arith.truncf %5 : vector<8x32xf32> to vector<8x32xbf16>
    %c0_4 = arith.constant 0 : index
    %c0_5 = arith.constant 0 : index
    %7 = vector.load %arg3[%c0_4, %c0_5] : memref<32x96xbf16, #tpu.memory_space<vmem>>, vector<32x96xbf16>
    %cst_6 = arith.constant dense<0.000000e+00> : vector<8x96xf32>
    %8 = tpu.matmul %6, %7, %cst_6 {dimension_numbers = #tpu.dot_dimension_numbers<[1], [0], [0], [1], [0, 0, 1, 1], [], []>} : vector<8x32xbf16>, vector<32x96xbf16>, vector<8x96xf32> -> vector<8x96xf32>
    %c0_7 = arith.constant 0 : index
    %c0_8 = arith.constant 0 : index
    %9 = vector.load %arg4[%c0_7, %c0_8] : memref<1x96xf32, #tpu.memory_space<vmem>>, vector<1x96xf32>
    %10 = vector.broadcast %9 : vector<1x96xf32> to vector<8x96xf32>
    %11 = arith.addf %8, %10 : vector<8x96xf32>
    %12 = vector.extract_strided_slice %11 {offsets = [0, 0], sizes = [8, 16], strides = [1, 1]} : vector<8x96xf32> to vector<8x16xf32>
    %13 = vector.extract_strided_slice %11 {offsets = [0, 16], sizes = [8, 16], strides = [1, 1]} : vector<8x96xf32> to vector<8x16xf32>
    %14 = vector.shape_cast %12 : vector<8x16xf32> to vector<1x8x16xf32>
    %15 = vector.shape_cast %13 : vector<8x16xf32> to vector<1x8x16xf32>
    %16 = tpu.concatenate %14, %15 in 0 : vector<1x8x16xf32>, vector<1x8x16xf32> -> vector<2x8x16xf32>
    %cst_9 = arith.constant 2.500000e-01 : f32
    %17 = vector.broadcast %cst_9 : f32 to vector<2x8x16xf32>
    %18 = arith.mulf %16, %17 : vector<2x8x16xf32>
    %19 = vector.extract_strided_slice %11 {offsets = [0, 32], sizes = [8, 16], strides = [1, 1]} : vector<8x96xf32> to vector<8x16xf32>
    %20 = vector.extract_strided_slice %11 {offsets = [0, 48], sizes = [8, 16], strides = [1, 1]} : vector<8x96xf32> to vector<8x16xf32>
    %21 = vector.shape_cast %19 : vector<8x16xf32> to vector<1x8x16xf32>
    %22 = vector.shape_cast %20 : vector<8x16xf32> to vector<1x8x16xf32>
    %23 = tpu.concatenate %21, %22 in 0 : vector<1x8x16xf32>, vector<1x8x16xf32> -> vector<2x8x16xf32>
    %24 = vector.extract_strided_slice %11 {offsets = [0, 64], sizes = [8, 16], strides = [1, 1]} : vector<8x96xf32> to vector<8x16xf32>
    %25 = vector.extract_strided_slice %11 {offsets = [0, 80], sizes = [8, 16], strides = [1, 1]} : vector<8x96xf32> to vector<8x16xf32>
    %26 = vector.shape_cast %24 : vector<8x16xf32> to vector<1x8x16xf32>
    %27 = vector.shape_cast %25 : vector<8x16xf32> to vector<1x8x16xf32>
    %28 = tpu.concatenate %26, %27 in 0 : vector<1x8x16xf32>, vector<1x8x16xf32> -> vector<2x8x16xf32>
    %29 = arith.truncf %18 : vector<2x8x16xf32> to vector<2x8x16xbf16>
    %30 = arith.truncf %23 : vector<2x8x16xf32> to vector<2x8x16xbf16>
    %cst_10 = arith.constant dense<0.000000e+00> : vector<2x8x8xf32>
    %31 = tpu.matmul %29, %30, %cst_10 {dimension_numbers = #tpu.dot_dimension_numbers<[2], [2], [1], [1], [0, 0, 0, 1, 1, 1], [0], [0]>} : vector<2x8x16xbf16>, vector<2x8x16xbf16>, vector<2x8x8xf32> -> vector<2x8x8xf32>
    %32 = tpu.iota {dimensions = array<i32: 1>} : vector<2x8x8xi32>
    %33 = tpu.iota {dimensions = array<i32: 2>} : vector<2x8x8xi32>
    %34 = arith.cmpi sle, %33, %32 : vector<2x8x8xi32>
    %cst_11 = arith.constant 0xFF800000 : f32
    %35 = vector.broadcast %cst_11 : f32 to vector<2x8x8xf32>
    %36 = arith.select %34, %31, %35 : vector<2x8x8xi1>, vector<2x8x8xf32>
    %cst_12 = arith.constant dense<0xFF800000> : vector<2x8xf32>
    %37 = vector.multi_reduction <maximumf>, %36, %cst_12 [2] : vector<2x8x8xf32> to vector<2x8xf32>
    %38 = vector.shape_cast %37 : vector<2x8xf32> to vector<2x8x1xf32>
    %39 = vector.broadcast %38 : vector<2x8x1xf32> to vector<2x8x8xf32>
    %40 = arith.subf %36, %39 : vector<2x8x8xf32>
    %41 = math.exp %40 : vector<2x8x8xf32>
    %cst_13 = arith.constant dense<0.000000e+00> : vector<2x8xf32>
    %42 = vector.multi_reduction <add>, %41, %cst_13 [2] : vector<2x8x8xf32> to vector<2x8xf32>
    %43 = vector.shape_cast %42 : vector<2x8xf32> to vector<2x8x1xf32>
    %44 = tpu.reciprocal %43 {approx = true} : vector<2x8x1xf32> -> vector<2x8x1xf32>
    %45 = vector.broadcast %44 : vector<2x8x1xf32> to vector<2x8x8xf32>
    %46 = arith.mulf %41, %45 : vector<2x8x8xf32>
    %47 = arith.truncf %46 : vector<2x8x8xf32> to vector<2x8x8xbf16>
    %48 = arith.truncf %28 : vector<2x8x16xf32> to vector<2x8x16xbf16>
    %cst_14 = arith.constant dense<0.000000e+00> : vector<2x8x16xf32>
    %49 = tpu.matmul %47, %48, %cst_14 {dimension_numbers = #tpu.dot_dimension_numbers<[2], [1], [1], [2], [0, 0, 0, 1, 1, 2], [0], [0]>} : vector<2x8x8xbf16>, vector<2x8x16xbf16>, vector<2x8x16xf32> -> vector<2x8x16xf32>
    %50 = vector.extract_strided_slice %49 {offsets = [0, 0, 0], sizes = [1, 8, 16], strides = [1, 1, 1]} : vector<2x8x16xf32> to vector<1x8x16xf32>
    %51 = vector.shape_cast %50 : vector<1x8x16xf32> to vector<8x16xf32>
    %52 = vector.extract_strided_slice %49 {offsets = [1, 0, 0], sizes = [1, 8, 16], strides = [1, 1, 1]} : vector<2x8x16xf32> to vector<1x8x16xf32>
    %53 = vector.shape_cast %52 : vector<1x8x16xf32> to vector<8x16xf32>
    %54 = tpu.concatenate %51, %53 in 1 : vector<8x16xf32>, vector<8x16xf32> -> vector<8x32xf32>
    %55 = arith.truncf %54 : vector<8x32xf32> to vector<8x32xbf16>
    %c0_15 = arith.constant 0 : index
    %c0_16 = arith.constant 0 : index
    %56 = vector.load %arg5[%c0_15, %c0_16] : memref<32x32xbf16, #tpu.memory_space<vmem>>, vector<32x32xbf16>
    %cst_17 = arith.constant dense<0.000000e+00> : vector<8x32xf32>
    %57 = tpu.matmul %55, %56, %cst_17 {dimension_numbers = #tpu.dot_dimension_numbers<[1], [0], [0], [1], [0, 0, 1, 1], [], []>} : vector<8x32xbf16>, vector<32x32xbf16>, vector<8x32xf32> -> vector<8x32xf32>
    %c0_18 = arith.constant 0 : index
    %c0_19 = arith.constant 0 : index
    %58 = vector.load %arg6[%c0_18, %c0_19] : memref<1x32xf32, #tpu.memory_space<vmem>>, vector<1x32xf32>
    %59 = vector.broadcast %58 : vector<1x32xf32> to vector<8x32xf32>
    %60 = arith.addf %57, %59 : vector<8x32xf32>
    %61 = arith.addf %5, %60 : vector<8x32xf32>
    %cst_20 = arith.constant dense<0.000000e+00> : vector<8xf32>
    %62 = vector.multi_reduction <add>, %61, %cst_20 [1] : vector<8x32xf32> to vector<8xf32>
    %63 = vector.shape_cast %62 : vector<8xf32> to vector<8x1xf32>
    %cst_21 = arith.constant 3.200000e+01 : f32
    %64 = vector.broadcast %cst_21 : f32 to vector<8x1xf32>
    %65 = arith.divf %63, %64 : vector<8x1xf32>
    %66 = vector.broadcast %65 : vector<8x1xf32> to vector<8x32xf32>
    %67 = arith.subf %61, %66 : vector<8x32xf32>
    %68 = arith.mulf %67, %67 : vector<8x32xf32>
    %cst_22 = arith.constant dense<0.000000e+00> : vector<8xf32>
    %69 = vector.multi_reduction <add>, %68, %cst_22 [1] : vector<8x32xf32> to vector<8xf32>
    %70 = vector.shape_cast %69 : vector<8xf32> to vector<8x1xf32>
    %cst_23 = arith.constant 3.200000e+01 : f32
    %71 = vector.broadcast %cst_23 : f32 to vector<8x1xf32>
    %72 = arith.divf %70, %71 : vector<8x1xf32>
    %73 = vector.broadcast %65 : vector<8x1xf32> to vector<8x32xf32>
    %74 = arith.subf %61, %73 : vector<8x32xf32>
    %cst_24 = arith.constant 9.99999974E-6 : f32
    %75 = vector.broadcast %cst_24 : f32 to vector<8x1xf32>
    %76 = arith.addf %72, %75 : vector<8x1xf32>
    %77 = math.rsqrt %76 : vector<8x1xf32>
    %78 = vector.broadcast %77 : vector<8x1xf32> to vector<8x32xf32>
    %79 = arith.mulf %74, %78 : vector<8x32xf32>
    %c0_25 = arith.constant 0 : index
    %c0_26 = arith.constant 0 : index
    %80 = vector.load %arg7[%c0_25, %c0_26] : memref<1x32xf32, #tpu.memory_space<vmem>>, vector<1x32xf32>
    %81 = vector.broadcast %80 : vector<1x32xf32> to vector<8x32xf32>
    %82 = arith.mulf %79, %81 : vector<8x32xf32>
    %c0_27 = arith.constant 0 : index
    %c0_28 = arith.constant 0 : index
    %83 = vector.load %arg8[%c0_27, %c0_28] : memref<1x32xf32, #tpu.memory_space<vmem>>, vector<1x32xf32>
    %84 = vector.broadcast %83 : vector<1x32xf32> to vector<8x32xf32>
    %85 = arith.addf %82, %84 : vector<8x32xf32>
    %86 = arith.truncf %85 : vector<8x32xf32> to vector<8x32xbf16>
    %c0_29 = arith.constant 0 : index
    %c0_30 = arith.constant 0 : index
    %87 = vector.load %arg9[%c0_29, %c0_30] : memref<32x64xbf16, #tpu.memory_space<vmem>>, vector<32x64xbf16>
    %cst_31 = arith.constant dense<0.000000e+00> : vector<8x64xf32>
    %88 = tpu.matmul %86, %87, %cst_31 {dimension_numbers = #tpu.dot_dimension_numbers<[1], [0], [0], [1], [0, 0, 1, 1], [], []>} : vector<8x32xbf16>, vector<32x64xbf16>, vector<8x64xf32> -> vector<8x64xf32>
    %c0_32 = arith.constant 0 : index
    %c0_33 = arith.constant 0 : index
    %89 = vector.load %arg10[%c0_32, %c0_33] : memref<1x64xf32, #tpu.memory_space<vmem>>, vector<1x64xf32>
    %90 = vector.broadcast %89 : vector<1x64xf32> to vector<8x64xf32>
    %91 = arith.addf %88, %90 : vector<8x64xf32>
    %cst_34 = arith.constant 0.000000e+00 : f32
    %92 = vector.broadcast %cst_34 : f32 to vector<8x64xf32>
    %93 = arith.maximumf %91, %92 : vector<8x64xf32>
    %94 = arith.truncf %93 : vector<8x64xf32> to vector<8x64xbf16>
    %c0_35 = arith.constant 0 : index
    %c0_36 = arith.constant 0 : index
    %95 = vector.load %arg11[%c0_35, %c0_36] : memref<64x32xbf16, #tpu.memory_space<vmem>>, vector<64x32xbf16>
    %cst_37 = arith.constant dense<0.000000e+00> : vector<8x32xf32>
    %96 = tpu.matmul %94, %95, %cst_37 {dimension_numbers = #tpu.dot_dimension_numbers<[1], [0], [0], [1], [0, 0, 1, 1], [], []>} : vector<8x64xbf16>, vector<64x32xbf16>, vector<8x32xf32> -> vector<8x32xf32>
    %c0_38 = arith.constant 0 : index
    %c0_39 = arith.constant 0 : index
    %97 = vector.load %arg12[%c0_38, %c0_39] : memref<1x32xf32, #tpu.memory_space<vmem>>, vector<1x32xf32>
    %98 = vector.broadcast %97 : vector<1x32xf32> to vector<8x32xf32>
    %99 = arith.addf %96, %98 : vector<8x32xf32>
    %100 = arith.addf %85, %99 : vector<8x32xf32>
    %cst_40 = arith.constant dense<0.000000e+00> : vector<8xf32>
    %101 = vector.multi_reduction <add>, %100, %cst_40 [1] : vector<8x32xf32> to vector<8xf32>
    %102 = vector.shape_cast %101 : vector<8xf32> to vector<8x1xf32>
    %cst_41 = arith.constant 3.200000e+01 : f32
    %103 = vector.broadcast %cst_41 : f32 to vector<8x1xf32>
    %104 = arith.divf %102, %103 : vector<8x1xf32>
    %105 = vector.broadcast %104 : vector<8x1xf32> to vector<8x32xf32>
    %106 = arith.subf %100, %105 : vector<8x32xf32>
    %107 = arith.mulf %106, %106 : vector<8x32xf32>
    %cst_42 = arith.constant dense<0.000000e+00> : vector<8xf32>
    %108 = vector.multi_reduction <add>, %107, %cst_42 [1] : vector<8x32xf32> to vector<8xf32>
    %109 = vector.shape_cast %108 : vector<8xf32> to vector<8x1xf32>
    %cst_43 = arith.constant 3.200000e+01 : f32
    %110 = vector.broadcast %cst_43 : f32 to vector<8x1xf32>
    %111 = arith.divf %109, %110 : vector<8x1xf32>
    %112 = vector.broadcast %104 : vector<8x1xf32> to vector<8x32xf32>
    %113 = arith.subf %100, %112 : vector<8x32xf32>
    %cst_44 = arith.constant 9.99999974E-6 : f32
    %114 = vector.broadcast %cst_44 : f32 to vector<8x1xf32>
    %115 = arith.addf %111, %114 : vector<8x1xf32>
    %116 = math.rsqrt %115 : vector<8x1xf32>
    %117 = vector.broadcast %116 : vector<8x1xf32> to vector<8x32xf32>
    %118 = arith.mulf %113, %117 : vector<8x32xf32>
    %c0_45 = arith.constant 0 : index
    %c0_46 = arith.constant 0 : index
    %119 = vector.load %arg13[%c0_45, %c0_46] : memref<1x32xf32, #tpu.memory_space<vmem>>, vector<1x32xf32>
    %120 = vector.broadcast %119 : vector<1x32xf32> to vector<8x32xf32>
    %121 = arith.mulf %118, %120 : vector<8x32xf32>
    %c0_47 = arith.constant 0 : index
    %c0_48 = arith.constant 0 : index
    %122 = vector.load %arg14[%c0_47, %c0_48] : memref<1x32xf32, #tpu.memory_space<vmem>>, vector<1x32xf32>
    %123 = vector.broadcast %122 : vector<1x32xf32> to vector<8x32xf32>
    %124 = arith.addf %121, %123 : vector<8x32xf32>
    %125 = arith.truncf %124 : vector<8x32xf32> to vector<8x32xbf16>
    %c0_49 = arith.constant 0 : index
    %c0_50 = arith.constant 0 : index
    %c0_51 = arith.constant 0 : index
    %126 = vector.load %arg15[%c0_49, %c0_50, %c0_51] : memref<1x8x32xbf16, #tpu.memory_space<vmem>>, vector<1x8x32xbf16>
    %127 = vector.shape_cast %126 : vector<1x8x32xbf16> to vector<8x32xbf16>
    %128 = vector.shape_cast %125 : vector<8x32xbf16> to vector<1x8x32xbf16>
    tpu.vector_store %arg15[%c0_49, %c0_50, %c0_51], %128 {strides = array<i32>} : memref<1x8x32xbf16, #tpu.memory_space<vmem>>, vector<1x8x32xbf16>,
    return
  }
  func.func @transform_0(%arg0: i32) -> (i32, i32, i32) {
    %c0_i32 = arith.constant 0 : i32
    %c0_i32_0 = arith.constant 0 : i32
    %c0_i32_1 = arith.constant 0 : i32
    return %arg0, %c0_i32, %c0_i32_0 : i32, i32, i32
  }
  func.func @transform_1(%arg0: i32) -> (i32, i32) {
    %c0_i32 = arith.constant 0 : i32
    %c0_i32_0 = arith.constant 0 : i32
    %c0_i32_1 = arith.constant 0 : i32
    return %c0_i32, %c0_i32_0 : i32, i32
  }
  func.func @transform_2(%arg0: i32) -> (i32, i32) {
    %c0_i32 = arith.constant 0 : i32
    %c0_i32_0 = arith.constant 0 : i32
    %c0_i32_1 = arith.constant 0 : i32
    return %c0_i32, %c0_i32_0 : i32, i32
  }
  func.func @transform_3(%arg0: i32) -> (i32, i32) {
    %c0_i32 = arith.constant 0 : i32
    %c0_i32_0 = arith.constant 0 : i32
    %c0_i32_1 = arith.constant 0 : i32
    return %c0_i32, %c0_i32_0 : i32, i32
  }
  func.func @transform_4(%arg0: i32) -> (i32, i32) {
    %c0_i32 = arith.constant 0 : i32
    %c0_i32_0 = arith.constant 0 : i32
    %c0_i32_1 = arith.constant 0 : i32
    return %c0_i32, %c0_i32_0 : i32, i32
  }
  func.func @transform_5(%arg0: i32) -> (i32, i32) {
    %c0_i32 = arith.constant 0 : i32
    %c0_i32_0 = arith.constant 0 : i32
    %c0_i32_1 = arith.constant 0 : i32
    return %c0_i32, %c0_i32_0 : i32, i32
  }
  func.func @transform_6(%arg0: i32) -> (i32, i32) {
    %c0_i32 = arith.constant 0 : i32
    %c0_i32_0 = arith.constant 0 : i32
    %c0_i32_1 = arith.constant 0 : i32
    return %c0_i32, %c0_i32_0 : i32, i32
  }
  func.func @transform_7(%arg0: i32) -> (i32, i32) {
    %c0_i32 = arith.constant 0 : i32
    %c0_i32_0 = arith.constant 0 : i32
    %c0_i32_1 = arith.constant 0 : i32
    return %c0_i32, %c0_i32_0 : i32, i32
  }
  func.func @transform_8(%arg0: i32) -> (i32, i32) {
    %c0_i32 = arith.constant 0 : i32
    %c0_i32_0 = arith.constant 0 : i32
    %c0_i32_1 = arith.constant 0 : i32
    return %c0_i32, %c0_i32_0 : i32, i32
  }
  func.func @transform_9(%arg0: i32) -> (i32, i32) {
    %c0_i32 = arith.constant 0 : i32
    %c0_i32_0 = arith.constant 0 : i32
    %c0_i32_1 = arith.constant 0 : i32
    return %c0_i32, %c0_i32_0 : i32, i32
  }
  func.func @transform_10(%arg0: i32) -> (i32, i32) {
    %c0_i32 = arith.constant 0 : i32
    %c0_i32_0 = arith.constant 0 : i32
    %c0_i32_1 = arith.constant 0 : i32
    return %c0_i32, %c0_i32_0 : i32, i32
  }
  func.func @transform_11(%arg0: i32) -> (i32, i32) {
    %c0_i32 = arith.constant 0 : i32
    %c0_i32_0 = arith.constant 0 : i32
    %c0_i32_1 = arith.constant 0 : i32
    return %c0_i32, %c0_i32_0 : i32, i32
  }
  func.func @transform_12(%arg0: i32) -> (i32, i32) {
    %c0_i32 = arith.constant 0 : i32
    %c0_i32_0 = arith.constant 0 : i32
    %c0_i32_1 = arith.constant 0 : i32
    return %c0_i32, %c0_i32_0 : i32, i32
  }
  func.func @transform_13(%arg0: i32) -> (i32, i32) {
    %c0_i32 = arith.constant 0 : i32
    %c0_i32_0 = arith.constant 0 : i32
    %c0_i32_1 = arith.constant 0 : i32
    return %c0_i32, %c0_i32_0 : i32, i32
  }
  func.func @transform_14(%arg0: i32) -> (i32, i32, i32) {
    %c0_i32 = arith.constant 0 : i32
    %c0_i32_0 = arith.constant 0 : i32
    %c0_i32_1 = arith.constant 0 : i32
    return %arg0, %c0_i32, %c0_i32_0 : i32, i32, i32
  }
}

module attributes {stable_mosaic.version = 11 : i64} {
  func.func @encoder_layer_kernel(%arg0: i32, %arg1: memref<1x8x32xbf16, #tpu.memory_space<vmem>>, %arg2: memref<8x32xf32, #tpu.memory_space<vmem>>, %arg3: memref<32x96xbf16, #tpu.memory_space<vmem>>, %arg4: memref<1x96xf32, #tpu.memory_space<vmem>>, %arg5: memref<32x32xbf16, #tpu.memory_space<vmem>>, %arg6: memref<1x32xf32, #tpu.memory_space<vmem>>, %arg7: memref<1x32xf32, #tpu.memory_space<vmem>>, %arg8: memref<1x32xf32, #tpu.memory_space<vmem>>, %arg9: memref<32x64xbf16, #tpu.memory_space<vmem>>, %arg10: memref<1x64xf32, #tpu.memory_space<vmem>>, %arg11: memref<64x32xbf16, #tpu.memory_space<vmem>>, %arg12: memref<1x32xf32, #tpu.memory_space<vmem>>, %arg13: memref<1x32xf32, #tpu.memory_space<vmem>>, %arg14: memref<1x32xf32, #tpu.memory_space<vmem>>, %arg15: memref<1x8x32xbf16, #tpu.memory_space<vmem>>) attributes {dimension_semantics = [#tpu.dimension_semantics<parallel>], iteration_bounds = array<i64: 2>, scalar_prefetch = 0 : i64, scratch_operands = 0 : i64, tpu.core_type = #tpu.core_type<tc>, window_params = [{transform_indices = @transform_0, window_bounds = array<i64: 1, 8, 32>}, {pipeline_mode = #tpu.pipeline_mode<synchronous>, transform_indices = @transform_1, window_bounds = array<i64: 8, 32>}, {pipeline_mode = #tpu.pipeline_mode<synchronous>, transform_indices = @transform_2, window_bounds = array<i64: 32, 96>}, {pipeline_mode = #tpu.pipeline_mode<synchronous>, transform_indices = @transform_3, window_bounds = array<i64: 1, 96>}, {pipeline_mode = #tpu.pipeline_mode<synchronous>, transform_indices = @transform_4, window_bounds = array<i64: 32, 32>}, {pipeline_mode = #tpu.pipeline_mode<synchronous>, transform_indices = @transform_5, window_bounds = array<i64: 1, 32>}, {pipeline_mode = #tpu.pipeline_mode<synchronous>, transform_indices = @transform_6, window_bounds = array<i64: 1, 32>}, {pipeline_mode = #tpu.pipeline_mode<synchronous>, transform_indices = @transform_7, window_bounds = array<i64: 1, 32>}, {pipeline_mode = #tpu.pipeline_mode<synchronous>, transform_indices = @transform_8, window_bounds = array<i64: 32, 64>}, {pipeline_mode = #tpu.pipeline_mode<synchronous>, transform_indices = @transform_9, window_bounds = array<i64: 1, 64>}, {pipeline_mode = #tpu.pipeline_mode<synchronous>, transform_indices = @transform_10, window_bounds = array<i64: 64, 32>}, {pipeline_mode = #tpu.pipeline_mode<synchronous>, transform_indices = @transform_11, window_bounds = array<i64: 1, 32>}, {pipeline_mode = #tpu.pipeline_mode<synchronous>, transform_indices = @transform_12, window_bounds = array<i64: 1, 32>}, {pipeline_mode = #tpu.pipeline_mode<synchronous>, transform_indices = @transform_13, window_bounds = array<i64: 1, 32>}, {transform_indices = @transform_14, window_bounds = array<i64: 1, 8, 32>}]} {
    %c0 = arith.constant 0 : index
    %c0_0 = arith.constant 0 : index
    %c0_1 = arith.constant 0 : index
    %0 = vector.load %arg1[%c0, %c0_0, %c0_1] : memref<1x8x32xbf16, #tpu.memory_space<vmem>>, vector<1x8x32xbf16>
    %1 = vector.shape_cast %0 : vector<1x8x32xbf16> to vector<8x32xbf16>
    %2 = arith.extf %1 : vector<8x32xbf16> to vector<8x32xf32>
    %3 = arith.truncf %2 : vector<8x32xf32> to vector<8x32xbf16>
    %c0_2 = arith.constant 0 : index
    %c0_3 = arith.constant 0 : index
    %4 = vector.load %arg3[%c0_2, %c0_3] : memref<32x96xbf16, #tpu.memory_space<vmem>>, vector<32x96xbf16>
    %cst = arith.constant dense<0.000000e+00> : vector<8x96xf32>
    %5 = tpu.matmul %3, %4, %cst {dimension_numbers = #tpu.dot_dimension_numbers<[1], [0], [0], [1], [0, 0, 1, 1], [], []>} : vector<8x32xbf16>, vector<32x96xbf16>, vector<8x96xf32> -> vector<8x96xf32>
    %c0_4 = arith.constant 0 : index
    %c0_5 = arith.constant 0 : index
    %6 = vector.load %arg4[%c0_4, %c0_5] : memref<1x96xf32, #tpu.memory_space<vmem>>, vector<1x96xf32>
    %7 = vector.broadcast %6 : vector<1x96xf32> to vector<8x96xf32>
    %8 = arith.addf %5, %7 : vector<8x96xf32>
    %9 = vector.extract_strided_slice %8 {offsets = [0, 0], sizes = [8, 16], strides = [1, 1]} : vector<8x96xf32> to vector<8x16xf32>
    %10 = vector.extract_strided_slice %8 {offsets = [0, 16], sizes = [8, 16], strides = [1, 1]} : vector<8x96xf32> to vector<8x16xf32>
    %11 = vector.shape_cast %9 : vector<8x16xf32> to vector<1x8x16xf32>
    %12 = vector.shape_cast %10 : vector<8x16xf32> to vector<1x8x16xf32>
    %13 = tpu.concatenate %11, %12 in 0 : vector<1x8x16xf32>, vector<1x8x16xf32> -> vector<2x8x16xf32>
    %cst_6 = arith.constant 2.500000e-01 : f32
    %14 = vector.broadcast %cst_6 : f32 to vector<2x8x16xf32>
    %15 = arith.mulf %13, %14 : vector<2x8x16xf32>
    %16 = vector.extract_strided_slice %8 {offsets = [0, 32], sizes = [8, 16], strides = [1, 1]} : vector<8x96xf32> to vector<8x16xf32>
    %17 = vector.extract_strided_slice %8 {offsets = [0, 48], sizes = [8, 16], strides = [1, 1]} : vector<8x96xf32> to vector<8x16xf32>
    %18 = vector.shape_cast %16 : vector<8x16xf32> to vector<1x8x16xf32>
    %19 = vector.shape_cast %17 : vector<8x16xf32> to vector<1x8x16xf32>
    %20 = tpu.concatenate %18, %19 in 0 : vector<1x8x16xf32>, vector<1x8x16xf32> -> vector<2x8x16xf32>
    %21 = vector.extract_strided_slice %8 {offsets = [0, 64], sizes = [8, 16], strides = [1, 1]} : vector<8x96xf32> to vector<8x16xf32>
    %22 = vector.extract_strided_slice %8 {offsets = [0, 80], sizes = [8, 16], strides = [1, 1]} : vector<8x96xf32> to vector<8x16xf32>
    %23 = vector.shape_cast %21 : vector<8x16xf32> to vector<1x8x16xf32>
    %24 = vector.shape_cast %22 : vector<8x16xf32> to vector<1x8x16xf32>
    %25 = tpu.concatenate %23, %24 in 0 : vector<1x8x16xf32>, vector<1x8x16xf32> -> vector<2x8x16xf32>
    %26 = arith.truncf %15 : vector<2x8x16xf32> to vector<2x8x16xbf16>
    %27 = arith.truncf %20 : vector<2x8x16xf32> to vector<2x8x16xbf16>
    %cst_7 = arith.constant dense<0.000000e+00> : vector<2x8x8xf32>
    %28 = tpu.matmul %26, %27, %cst_7 {dimension_numbers = #tpu.dot_dimension_numbers<[2], [2], [1], [1], [0, 0, 0, 1, 1, 1], [0], [0]>} : vector<2x8x16xbf16>, vector<2x8x16xbf16>, vector<2x8x8xf32> -> vector<2x8x8xf32>
    %29 = tpu.iota {dimensions = array<i32: 1>} : vector<2x8x8xi32>
    %30 = tpu.iota {dimensions = array<i32: 2>} : vector<2x8x8xi32>
    %31 = arith.cmpi sle, %30, %29 : vector<2x8x8xi32>
    %cst_8 = arith.constant 0xFF800000 : f32
    %32 = vector.broadcast %cst_8 : f32 to vector<2x8x8xf32>
    %33 = arith.select %31, %28, %32 : vector<2x8x8xi1>, vector<2x8x8xf32>
    %cst_9 = arith.constant dense<0xFF800000> : vector<2x8xf32>
    %34 = vector.multi_reduction <maximumf>, %33, %cst_9 [2] : vector<2x8x8xf32> to vector<2x8xf32>
    %35 = vector.shape_cast %34 : vector<2x8xf32> to vector<2x8x1xf32>
    %36 = vector.broadcast %35 : vector<2x8x1xf32> to vector<2x8x8xf32>
    %37 = arith.subf %33, %36 : vector<2x8x8xf32>
    %38 = math.exp %37 : vector<2x8x8xf32>
    %cst_10 = arith.constant dense<0.000000e+00> : vector<2x8xf32>
    %39 = vector.multi_reduction <add>, %38, %cst_10 [2] : vector<2x8x8xf32> to vector<2x8xf32>
    %40 = vector.shape_cast %39 : vector<2x8xf32> to vector<2x8x1xf32>
    %41 = tpu.reciprocal %40 {approx = true} : vector<2x8x1xf32> -> vector<2x8x1xf32>
    %42 = vector.broadcast %41 : vector<2x8x1xf32> to vector<2x8x8xf32>
    %43 = arith.mulf %38, %42 : vector<2x8x8xf32>
    %44 = arith.truncf %43 : vector<2x8x8xf32> to vector<2x8x8xbf16>
    %45 = arith.truncf %25 : vector<2x8x16xf32> to vector<2x8x16xbf16>
    %cst_11 = arith.constant dense<0.000000e+00> : vector<2x8x16xf32>
    %46 = tpu.matmul %44, %45, %cst_11 {dimension_numbers = #tpu.dot_dimension_numbers<[2], [1], [1], [2], [0, 0, 0, 1, 1, 2], [0], [0]>} : vector<2x8x8xbf16>, vector<2x8x16xbf16>, vector<2x8x16xf32> -> vector<2x8x16xf32>
    %47 = vector.extract_strided_slice %46 {offsets = [0, 0, 0], sizes = [1, 8, 16], strides = [1, 1, 1]} : vector<2x8x16xf32> to vector<1x8x16xf32>
    %48 = vector.shape_cast %47 : vector<1x8x16xf32> to vector<8x16xf32>
    %49 = vector.extract_strided_slice %46 {offsets = [1, 0, 0], sizes = [1, 8, 16], strides = [1, 1, 1]} : vector<2x8x16xf32> to vector<1x8x16xf32>
    %50 = vector.shape_cast %49 : vector<1x8x16xf32> to vector<8x16xf32>
    %51 = tpu.concatenate %48, %50 in 1 : vector<8x16xf32>, vector<8x16xf32> -> vector<8x32xf32>
    %52 = arith.truncf %51 : vector<8x32xf32> to vector<8x32xbf16>
    %c0_12 = arith.constant 0 : index
    %c0_13 = arith.constant 0 : index
    %53 = vector.load %arg5[%c0_12, %c0_13] : memref<32x32xbf16, #tpu.memory_space<vmem>>, vector<32x32xbf16>
    %cst_14 = arith.constant dense<0.000000e+00> : vector<8x32xf32>
    %54 = tpu.matmul %52, %53, %cst_14 {dimension_numbers = #tpu.dot_dimension_numbers<[1], [0], [0], [1], [0, 0, 1, 1], [], []>} : vector<8x32xbf16>, vector<32x32xbf16>, vector<8x32xf32> -> vector<8x32xf32>
    %c0_15 = arith.constant 0 : index
    %c0_16 = arith.constant 0 : index
    %55 = vector.load %arg6[%c0_15, %c0_16] : memref<1x32xf32, #tpu.memory_space<vmem>>, vector<1x32xf32>
    %56 = vector.broadcast %55 : vector<1x32xf32> to vector<8x32xf32>
    %57 = arith.addf %54, %56 : vector<8x32xf32>
    %58 = arith.addf %2, %57 : vector<8x32xf32>
    %cst_17 = arith.constant dense<0.000000e+00> : vector<8xf32>
    %59 = vector.multi_reduction <add>, %58, %cst_17 [1] : vector<8x32xf32> to vector<8xf32>
    %60 = vector.shape_cast %59 : vector<8xf32> to vector<8x1xf32>
    %cst_18 = arith.constant 3.200000e+01 : f32
    %61 = vector.broadcast %cst_18 : f32 to vector<8x1xf32>
    %62 = arith.divf %60, %61 : vector<8x1xf32>
    %63 = vector.broadcast %62 : vector<8x1xf32> to vector<8x32xf32>
    %64 = arith.subf %58, %63 : vector<8x32xf32>
    %65 = arith.mulf %64, %64 : vector<8x32xf32>
    %cst_19 = arith.constant dense<0.000000e+00> : vector<8xf32>
    %66 = vector.multi_reduction <add>, %65, %cst_19 [1] : vector<8x32xf32> to vector<8xf32>
    %67 = vector.shape_cast %66 : vector<8xf32> to vector<8x1xf32>
    %cst_20 = arith.constant 3.200000e+01 : f32
    %68 = vector.broadcast %cst_20 : f32 to vector<8x1xf32>
    %69 = arith.divf %67, %68 : vector<8x1xf32>
    %70 = vector.broadcast %62 : vector<8x1xf32> to vector<8x32xf32>
    %71 = arith.subf %58, %70 : vector<8x32xf32>
    %cst_21 = arith.constant 9.99999974E-6 : f32
    %72 = vector.broadcast %cst_21 : f32 to vector<8x1xf32>
    %73 = arith.addf %69, %72 : vector<8x1xf32>
    %74 = math.rsqrt %73 : vector<8x1xf32>
    %75 = vector.broadcast %74 : vector<8x1xf32> to vector<8x32xf32>
    %76 = arith.mulf %71, %75 : vector<8x32xf32>
    %c0_22 = arith.constant 0 : index
    %c0_23 = arith.constant 0 : index
    %77 = vector.load %arg7[%c0_22, %c0_23] : memref<1x32xf32, #tpu.memory_space<vmem>>, vector<1x32xf32>
    %78 = vector.broadcast %77 : vector<1x32xf32> to vector<8x32xf32>
    %79 = arith.mulf %76, %78 : vector<8x32xf32>
    %c0_24 = arith.constant 0 : index
    %c0_25 = arith.constant 0 : index
    %80 = vector.load %arg8[%c0_24, %c0_25] : memref<1x32xf32, #tpu.memory_space<vmem>>, vector<1x32xf32>
    %81 = vector.broadcast %80 : vector<1x32xf32> to vector<8x32xf32>
    %82 = arith.addf %79, %81 : vector<8x32xf32>
    %83 = arith.truncf %82 : vector<8x32xf32> to vector<8x32xbf16>
    %c0_26 = arith.constant 0 : index
    %c0_27 = arith.constant 0 : index
    %84 = vector.load %arg9[%c0_26, %c0_27] : memref<32x64xbf16, #tpu.memory_space<vmem>>, vector<32x64xbf16>
    %cst_28 = arith.constant dense<0.000000e+00> : vector<8x64xf32>
    %85 = tpu.matmul %83, %84, %cst_28 {dimension_numbers = #tpu.dot_dimension_numbers<[1], [0], [0], [1], [0, 0, 1, 1], [], []>} : vector<8x32xbf16>, vector<32x64xbf16>, vector<8x64xf32> -> vector<8x64xf32>
    %c0_29 = arith.constant 0 : index
    %c0_30 = arith.constant 0 : index
    %86 = vector.load %arg10[%c0_29, %c0_30] : memref<1x64xf32, #tpu.memory_space<vmem>>, vector<1x64xf32>
    %87 = vector.broadcast %86 : vector<1x64xf32> to vector<8x64xf32>
    %88 = arith.addf %85, %87 : vector<8x64xf32>
    %cst_31 = arith.constant 0.000000e+00 : f32
    %89 = vector.broadcast %cst_31 : f32 to vector<8x64xf32>
    %90 = arith.maximumf %88, %89 : vector<8x64xf32>
    %91 = arith.truncf %90 : vector<8x64xf32> to vector<8x64xbf16>
    %c0_32 = arith.constant 0 : index
    %c0_33 = arith.constant 0 : index
    %92 = vector.load %arg11[%c0_32, %c0_33] : memref<64x32xbf16, #tpu.memory_space<vmem>>, vector<64x32xbf16>
    %cst_34 = arith.constant dense<0.000000e+00> : vector<8x32xf32>
    %93 = tpu.matmul %91, %92, %cst_34 {dimension_numbers = #tpu.dot_dimension_numbers<[1], [0], [0], [1], [0, 0, 1, 1], [], []>} : vector<8x64xbf16>, vector<64x32xbf16>, vector<8x32xf32> -> vector<8x32xf32>
    %c0_35 = arith.constant 0 : index
    %c0_36 = arith.constant 0 : index
    %94 = vector.load %arg12[%c0_35, %c0_36] : memref<1x32xf32, #tpu.memory_space<vmem>>, vector<1x32xf32>
    %95 = vector.broadcast %94 : vector<1x32xf32> to vector<8x32xf32>
    %96 = arith.addf %93, %95 : vector<8x32xf32>
    %97 = arith.addf %82, %96 : vector<8x32xf32>
    %cst_37 = arith.constant dense<0.000000e+00> : vector<8xf32>
    %98 = vector.multi_reduction <add>, %97, %cst_37 [1] : vector<8x32xf32> to vector<8xf32>
    %99 = vector.shape_cast %98 : vector<8xf32> to vector<8x1xf32>
    %cst_38 = arith.constant 3.200000e+01 : f32
    %100 = vector.broadcast %cst_38 : f32 to vector<8x1xf32>
    %101 = arith.divf %99, %100 : vector<8x1xf32>
    %102 = vector.broadcast %101 : vector<8x1xf32> to vector<8x32xf32>
    %103 = arith.subf %97, %102 : vector<8x32xf32>
    %104 = arith.mulf %103, %103 : vector<8x32xf32>
    %cst_39 = arith.constant dense<0.000000e+00> : vector<8xf32>
    %105 = vector.multi_reduction <add>, %104, %cst_39 [1] : vector<8x32xf32> to vector<8xf32>
    %106 = vector.shape_cast %105 : vector<8xf32> to vector<8x1xf32>
    %cst_40 = arith.constant 3.200000e+01 : f32
    %107 = vector.broadcast %cst_40 : f32 to vector<8x1xf32>
    %108 = arith.divf %106, %107 : vector<8x1xf32>
    %109 = vector.broadcast %101 : vector<8x1xf32> to vector<8x32xf32>
    %110 = arith.subf %97, %109 : vector<8x32xf32>
    %cst_41 = arith.constant 9.99999974E-6 : f32
    %111 = vector.broadcast %cst_41 : f32 to vector<8x1xf32>
    %112 = arith.addf %108, %111 : vector<8x1xf32>
    %113 = math.rsqrt %112 : vector<8x1xf32>
    %114 = vector.broadcast %113 : vector<8x1xf32> to vector<8x32xf32>
    %115 = arith.mulf %110, %114 : vector<8x32xf32>
    %c0_42 = arith.constant 0 : index
    %c0_43 = arith.constant 0 : index
    %116 = vector.load %arg13[%c0_42, %c0_43] : memref<1x32xf32, #tpu.memory_space<vmem>>, vector<1x32xf32>
    %117 = vector.broadcast %116 : vector<1x32xf32> to vector<8x32xf32>
    %118 = arith.mulf %115, %117 : vector<8x32xf32>
    %c0_44 = arith.constant 0 : index
    %c0_45 = arith.constant 0 : index
    %119 = vector.load %arg14[%c0_44, %c0_45] : memref<1x32xf32, #tpu.memory_space<vmem>>, vector<1x32xf32>
    %120 = vector.broadcast %119 : vector<1x32xf32> to vector<8x32xf32>
    %121 = arith.addf %118, %120 : vector<8x32xf32>
    %122 = arith.truncf %121 : vector<8x32xf32> to vector<8x32xbf16>
    %c0_46 = arith.constant 0 : index
    %c0_47 = arith.constant 0 : index
    %c0_48 = arith.constant 0 : index
    %123 = vector.load %arg15[%c0_46, %c0_47, %c0_48] : memref<1x8x32xbf16, #tpu.memory_space<vmem>>, vector<1x8x32xbf16>
    %124 = vector.shape_cast %123 : vector<1x8x32xbf16> to vector<8x32xbf16>
    %125 = vector.shape_cast %122 : vector<8x32xbf16> to vector<1x8x32xbf16>
    tpu.vector_store %arg15[%c0_46, %c0_47, %c0_48], %125 {strides = array<i32>} : memref<1x8x32xbf16, #tpu.memory_space<vmem>>, vector<1x8x32xbf16>,
    return
  }
  func.func @transform_0(%arg0: i32) -> (i32, i32, i32) {
    %c0_i32 = arith.constant 0 : i32
    %c0_i32_0 = arith.constant 0 : i32
    %c0_i32_1 = arith.constant 0 : i32
    return %arg0, %c0_i32, %c0_i32_0 : i32, i32, i32
  }
  func.func @transform_1(%arg0: i32) -> (i32, i32) {
    %c0_i32 = arith.constant 0 : i32
    %c0_i32_0 = arith.constant 0 : i32
    %c0_i32_1 = arith.constant 0 : i32
    return %c0_i32, %c0_i32_0 : i32, i32
  }
  func.func @transform_2(%arg0: i32) -> (i32, i32) {
    %c0_i32 = arith.constant 0 : i32
    %c0_i32_0 = arith.constant 0 : i32
    %c0_i32_1 = arith.constant 0 : i32
    return %c0_i32, %c0_i32_0 : i32, i32
  }
  func.func @transform_3(%arg0: i32) -> (i32, i32) {
    %c0_i32 = arith.constant 0 : i32
    %c0_i32_0 = arith.constant 0 : i32
    %c0_i32_1 = arith.constant 0 : i32
    return %c0_i32, %c0_i32_0 : i32, i32
  }
  func.func @transform_4(%arg0: i32) -> (i32, i32) {
    %c0_i32 = arith.constant 0 : i32
    %c0_i32_0 = arith.constant 0 : i32
    %c0_i32_1 = arith.constant 0 : i32
    return %c0_i32, %c0_i32_0 : i32, i32
  }
  func.func @transform_5(%arg0: i32) -> (i32, i32) {
    %c0_i32 = arith.constant 0 : i32
    %c0_i32_0 = arith.constant 0 : i32
    %c0_i32_1 = arith.constant 0 : i32
    return %c0_i32, %c0_i32_0 : i32, i32
  }
  func.func @transform_6(%arg0: i32) -> (i32, i32) {
    %c0_i32 = arith.constant 0 : i32
    %c0_i32_0 = arith.constant 0 : i32
    %c0_i32_1 = arith.constant 0 : i32
    return %c0_i32, %c0_i32_0 : i32, i32
  }
  func.func @transform_7(%arg0: i32) -> (i32, i32) {
    %c0_i32 = arith.constant 0 : i32
    %c0_i32_0 = arith.constant 0 : i32
    %c0_i32_1 = arith.constant 0 : i32
    return %c0_i32, %c0_i32_0 : i32, i32
  }
  func.func @transform_8(%arg0: i32) -> (i32, i32) {
    %c0_i32 = arith.constant 0 : i32
    %c0_i32_0 = arith.constant 0 : i32
    %c0_i32_1 = arith.constant 0 : i32
    return %c0_i32, %c0_i32_0 : i32, i32
  }
  func.func @transform_9(%arg0: i32) -> (i32, i32) {
    %c0_i32 = arith.constant 0 : i32
    %c0_i32_0 = arith.constant 0 : i32
    %c0_i32_1 = arith.constant 0 : i32
    return %c0_i32, %c0_i32_0 : i32, i32
  }
  func.func @transform_10(%arg0: i32) -> (i32, i32) {
    %c0_i32 = arith.constant 0 : i32
    %c0_i32_0 = arith.constant 0 : i32
    %c0_i32_1 = arith.constant 0 : i32
    return %c0_i32, %c0_i32_0 : i32, i32
  }
  func.func @transform_11(%arg0: i32) -> (i32, i32) {
    %c0_i32 = arith.constant 0 : i32
    %c0_i32_0 = arith.constant 0 : i32
    %c0_i32_1 = arith.constant 0 : i32
    return %c0_i32, %c0_i32_0 : i32, i32
  }
  func.func @transform_12(%arg0: i32) -> (i32, i32) {
    %c0_i32 = arith.constant 0 : i32
    %c0_i32_0 = arith.constant 0 : i32
    %c0_i32_1 = arith.constant 0 : i32
    return %c0_i32, %c0_i32_0 : i32, i32
  }
  func.func @transform_13(%arg0: i32) -> (i32, i32) {
    %c0_i32 = arith.constant 0 : i32
    %c0_i32_0 = arith.constant 0 : i32
    %c0_i32_1 = arith.constant 0 : i32
    return %c0_i32, %c0_i32_0 : i32, i32
  }
  func.func @transform_14(%arg0: i32) -> (i32, i32, i32) {
    %c0_i32 = arith.constant 0 : i32
    %c0_i32_0 = arith.constant 0 : i32
    %c0_i32_1 = arith.constant 0 : i32
    return %arg0, %c0_i32, %c0_i32_0 : i32, i32, i32
  }
}

module attributes {stable_mosaic.version = 11 : i64} {
  func.func @decoder_kernel(%arg0: i32, %arg1: i32, %arg2: memref<16x32xbf16, #tpu.memory_space<vmem>>, %arg3: memref<32x128xbf16, #tpu.memory_space<vmem>>, %arg4: memref<1x128xf32, #tpu.memory_space<vmem>>, %arg5: memref<16x128xf32, #tpu.memory_space<vmem>>) attributes {dimension_semantics = [#tpu.dimension_semantics<parallel>, #tpu.dimension_semantics<parallel>], iteration_bounds = array<i64: 1, 1>, scalar_prefetch = 0 : i64, scratch_operands = 0 : i64, tpu.core_type = #tpu.core_type<tc>, window_params = [{transform_indices = @transform_0, window_bounds = array<i64: 16, 32>}, {transform_indices = @transform_1, window_bounds = array<i64: 32, 128>}, {transform_indices = @transform_2, window_bounds = array<i64: 1, 128>}, {transform_indices = @transform_3, window_bounds = array<i64: 16, 128>}]} {
    %c0 = arith.constant 0 : index
    %c0_0 = arith.constant 0 : index
    %0 = vector.load %arg2[%c0, %c0_0] : memref<16x32xbf16, #tpu.memory_space<vmem>>, vector<16x32xbf16>
    %c0_1 = arith.constant 0 : index
    %c0_2 = arith.constant 0 : index
    %1 = vector.load %arg3[%c0_1, %c0_2] : memref<32x128xbf16, #tpu.memory_space<vmem>>, vector<32x128xbf16>
    %cst = arith.constant dense<0.000000e+00> : vector<16x128xf32>
    %2 = tpu.matmul %0, %1, %cst {dimension_numbers = #tpu.dot_dimension_numbers<[1], [0], [0], [1], [0, 0, 1, 1], [], []>} : vector<16x32xbf16>, vector<32x128xbf16>, vector<16x128xf32> -> vector<16x128xf32>
    %c0_3 = arith.constant 0 : index
    %c0_4 = arith.constant 0 : index
    %3 = vector.load %arg4[%c0_3, %c0_4] : memref<1x128xf32, #tpu.memory_space<vmem>>, vector<1x128xf32>
    %4 = vector.broadcast %3 : vector<1x128xf32> to vector<16x128xf32>
    %5 = arith.addf %2, %4 : vector<16x128xf32>
    %c0_5 = arith.constant 0 : index
    %c0_6 = arith.constant 0 : index
    %6 = vector.load %arg5[%c0_5, %c0_6] : memref<16x128xf32, #tpu.memory_space<vmem>>, vector<16x128xf32>
    tpu.vector_store %arg5[%c0_5, %c0_6], %5 {strides = array<i32>} : memref<16x128xf32, #tpu.memory_space<vmem>>, vector<16x128xf32>,
    return
  }
  func.func @transform_0(%arg0: i32, %arg1: i32) -> (i32, i32) {
    %c0_i32 = arith.constant 0 : i32
    %c0_i32_0 = arith.constant 0 : i32
    return %arg1, %c0_i32 : i32, i32
  }
  func.func @transform_1(%arg0: i32, %arg1: i32) -> (i32, i32) {
    %c0_i32 = arith.constant 0 : i32
    %c0_i32_0 = arith.constant 0 : i32
    return %c0_i32, %arg0 : i32, i32
  }
  func.func @transform_2(%arg0: i32, %arg1: i32) -> (i32, i32) {
    %c0_i32 = arith.constant 0 : i32
    %c0_i32_0 = arith.constant 0 : i32
    return %c0_i32, %arg0 : i32, i32
  }
  func.func @transform_3(%arg0: i32, %arg1: i32) -> (i32, i32) {
    %c0_i32 = arith.constant 0 : i32
    return %arg1, %arg0 : i32, i32
  }
}

</mosaic_0001>

<bundles_post_ra>
// kernel: transformer_lm_forward.5
= control target key start
LH: loop header
LB: loop body
LE: loop exit
PB: predicated region body
PF: predicated region fallthrough
CT: control target
= control target key end

     0   :  { %s165_s0 = inlined_call_operand.vmem [shape: bf16[16,32], index: 0, kind: input, shape index: {}]   ;;  %s166_s1 = inlined_call_operand.vmem [shape: bf16[32,128], index: 1, kind: input, shape index: {}]   ;;  %s167_s2 = inlined_call_operand.vmem [shape: f32[1,128], index: 2, kind: input, shape index: {}]   ;;  %s168_s3 = inlined_call_operand.hbm [shape: f32[16,128], index: 3, kind: output, shape index: {}]  }
   0x1   :  { %v96_v0 = vld [vmem:[%s166_s1 + $0x8] sm:$0xff] }
   0x2   :  { %8 = vsyncpa [#allocation3], 0  ;;  %53 = vmatpush.bf16.msra.mxu0 %v96_v0  ;;  %v95_v1 = vld [vmem:[%s166_s1] sm:$0xff]  ;;  %vm43_vm0 = vcmask 261120   ;;  %s127_s20 = smov [#allocation2]   ;;  %s69_s1 = sshll.u32 %s168_s3, 4  ;;  %s70_s1 = int_to_ptr.hbm [resolvable:$true] %s69_s1 }
   0x3   :  { %v94_v2 = vld [vmem:[%s165_s0] sm:$0xff]  ;;  %s67_s21 = sshll.u32 %s127_s20, 4  ;;  %s128_s0 = smov 128   ;;  %s68_s21 = int_to_ptr.vmem [resolvable:$true] %s67_s21 }
   0x4   :  { %v100_v3 = vld [vmem:[%s167_s2] ss:$0 sm:$0xff]  ;;  %s129_s24 = smov 8  }
   0x6   :  { %54 = vmatpush.bf16.msra.mxu0 %v95_v1 }
   0x9   :  { %93 = vmatmul.msk.bf16.vlgmr.msra.gmra.mxu0 %vm43_vm0, %v94_v2 }
  0x86   :  { %v56_v4 = vpop.f32.mrf.mxu0 }
  0x87   :  { %v57_v5 = vadd.f32 %v100_v3, %v56_v4 }
  0x89   :  { %61 = vst [vmem:[#allocation2] sm:$0xff] %v57_v5 }
  0x8e   :  { %v58_v6 = vpop.f32.mrf.mxu0 }
  0x8f   :  { %v59_v7 = vadd.f32 %v100_v3, %v58_v6 }
  0x91   :  { %62 = vst [vmem:[#allocation2 + $0x8] sm:$0xff] %v59_v7 }
  0x92   :  { %75 = dma.vmem_to_hbm [thread:$0]  %s68_s21, 256, %s70_s1, [#allocation3], %s128_s0, %s128_s0, %s129_s24  }
  0x93   :  { %125 = dma.done.wait [#allocation3], 256  }
  0x94   :  { %126 = vsyncadd [#allocation3], 4294967040 }
  0x95   :  { %80 = vsyncpa [#allocation3], 1 }

// kernel: transformer_lm_forward.3
= control target key start
LH: loop header
LB: loop body
LE: loop exit
PB: predicated region body
PF: predicated region fallthrough
CT: control target
= control target key end

     0   :  { %s1093_s29 = smov 0   ;;  %s1194_s0 = inlined_call_operand.vmem [shape: f32[2,8,32], index: 0, kind: input, shape index: {}]   ;;  %s1195_s1 = inlined_call_operand.vmem [shape: f32[8,32], index: 1, kind: input, shape index: {}]   ;;  %s1196_s2 = inlined_call_operand.vmem [shape: bf16[32,96], index: 2, kind: input, shape index: {}]   ;;  %s1197_s3 = inlined_call_operand.vmem [shape: f32[1,96], index: 3, kind: input, shape index: {}]   ;;  %s1198_s4 = inlined_call_operand.vmem [shape: bf16[32,32], index: 4, kind: input, shape index: {}]   ;;  %s1199_s5 = inlined_call_operand.vmem [shape: f32[1,32], index: 5, kind: input, shape index: {}]   ;;  %s1200_s6 = inlined_call_operand.vmem [shape: f32[1,32], index: 6, kind: input, shape index: {}]   ;;  %s1201_s7 = inlined_call_operand.vmem [shape: f32[1,32], index: 7, kind: input, shape index: {}]   ;;  %s1202_s8 = inlined_call_operand.vmem [shape: bf16[32,64], index: 8, kind: input, shape index: {}]   ;;  %s1203_s9 = inlined_call_operand.vmem [shape: f32[1,64], index: 9, kind: input, shape index: {}]   ;;  %s1204_s10 = inlined_call_operand.vmem [shape: bf16[64,32], index: 10, kind: input, shape index: {}]   ;;  %s1205_s11 = inlined_call_operand.vmem [shape: f32[1,32], index: 11, kind: input, shape index: {}]   ;;  %s1206_s12 = inlined_call_operand.vmem [shape: f32[1,32], index: 12, kind: input, shape index: {}]   ;;  %s1207_s13 = inlined_call_operand.vmem [shape: f32[1,32], index: 13, kind: input, shape index: {}]   ;;  %s1208_s14 = inlined_call_operand.vmem [shape: bf16[2,8,32], index: 14, kind: output, shape index: {}]  }
   0x1 LB: > { %s903_s30 = sadd.s32 4294967295, %s1011_s29   ;;  %p907_p0 = scmp.ge.s32.totalorder %s1011_s29, 1  ;;  %s1011_s29 = sphi %s1093_s29, %s24_s29  }
   0x2   : > { %p411_p1 = scmp.lt.s32.totalorder %s1011_s29, 3 }
   0x4   : > { %p412_p2 = pnand %p907_p0, %p411_p1 }
   0x5   : > { %p455_p3 = scmp.lt.s32.totalorder (!%p412_p2), %s903_s30, 1  ;;  %s1013_s27 = smov (!%p412_p2), 112  }
   0x6   : > { %415 = sbr.rel (%p412_p2) target bundleno = 1947 (0x79b), region = 76  ;;  %s1014_s28 = smov (!%p412_p2), 96  }
   0x7   : > { %s1015_s15 = smov (!%p412_p2), 64   ;;  %s1016_s20 = smov (!%p412_p2), 16  }
   0xb   : > { %v961_v0 = vld [vmem:[%s1196_s2 + $0x8] sm:$0xff]  ;;  %v960_v1 = vld [vmem:[%s1196_s2] sm:$0xff]  ;;  %s1210_s30 = smov (!%p455_p3, %s903_s30), 1  ;;  %vm489_vm0 = vcmask 261120   ;;  %vm521_vm1 = vcmask 130048   ;;  %vm602_vm2 = vcmask 1043456   ;;  %v565_v30 = vlaneseq }
   0xc   : > { %499 = vmatpush.bf16.msra.mxu0 %v961_v0  ;;  %s908_s19 = sshll.u32 %s1210_s30, 3  ;;  %v466_v3 = vld [vmem:[%s1195_s1] sm:$0xff]  ;;  %vm572_vm4 = vcmask 64512   ;;  %v963_v61 = vld [vmem:[%s1198_s4 + $0x8] sm:$0xff]  ;;  %vm797_vm9 = vcmask 523264   ;;  %vm848_vm13 = vcmask 257024  }
   0xd   : > { %s458_s22 = scalar_lea.vmem %s1194_s0, %s908_s19  ;;  %v983_v7 = vld [vmem:[%s1197_s3] ss:$0 sm:$0xff]  ;;  %v566_v31 = vshrl.u32 %v565_v30, 7  ;;  %v568_v32 = vand.u32 127, %v565_v30  ;;  %s909_s19 = sshll.u32 %s1210_s30, 2 }
   0xe   : > { %v464_v2 = vld [vmem:[%s458_s22] sm:$0xff]  ;;  %s462_s22 = scalar_lea.vmem %s1208_s14, %s909_s19 }
   0xf   : > { %v465_v4 = vmul.f32 5.656854, %v464_v2  ;;  %vm569_vm3 = vcmp.le.s32.totalorder %v568_v32, %v566_v31  ;;  %v962_v62 = vld [vmem:[%s1198_s4] sm:$0xff] }
  0x10   : > { %500 = vmatpush.bf16.msra.mxu0 %v960_v1 }
  0x11   : > { %v1116_v5 = vadd.f32 %v466_v3, %v465_v4  ;;  %v984_v4 = vld [vmem:[%s1199_s5] ss:$0 sm:$0xff] }
  0x13   : > { %v468_v6 = vpack.c.bf16 %v1116_v5, %v1116_v5 }
  0x14   : > { %675 = vmatpush.bf16.msrb.mxu0 %v963_v61 }
  0x15   : > { %918 = vmatmul.msk.bf16.vlgmr.msra.gmra.mxu0 %vm489_vm0, %v468_v6 }
  0x18   : > { %676 = vmatpush.bf16.msrb.mxu0 %v962_v62 }
  0x92   : > { %v502_v8 = vpop.f32.mrf.mxu0 }
  0x93   : > { %v503_v9 = vadd.f32 %v983_v7, %v502_v8 }
  0x95   : > { %507 = vrot.lane.b32.xlu0 %v503_v9, %s1013_s27  ;;  %v514_v10 = vpack.c.bf16 %v503_v9, %v503_v9  ;;  %v510_v20 = vmul.f32 0.25, %v503_v9 }
  0x97   : > { %v517_v11 = vunpack.c.l.b16 %v514_v10  ;;  %v512_v21 = vpack.c.bf16 %v510_v20, %v510_v20 }
  0x99   : > { %v518_v13 = vpack.c.b16 %v517_v11, %v517_v11  ;;  %v1017_v11 = vmov 32.0  }
  0x9a   : > { %v504_v12 = vpop.f32.mrf.mxu0 }
  0x9d   : > { %519 = vrot.lane.b32.xlu0 %v518_v13, %s1014_s28 }
  0xa5   : > { %597 = vrot.lane.b32.xlu0 %v518_v13, %s1015_s15 }
 0x107   : > { %v508_v14 = vpop.permute.xlu0 %507 }
 0x108   : > { %v515_v15 = vpack.c.bf16 %v508_v14, %v508_v14  ;;  %v511_v28 = vmul.f32 0.25, %v508_v14 }
 0x10a   : > { %v542_v16 = vunpack.c.l.b16 %v515_v15  ;;  %v513_v29 = vpack.c.bf16 %v511_v28, %v511_v28 }
 0x10c   : > { %v543_v17 = vpack.c.b16 %v542_v16, %v542_v16 }
 0x10e   : > { %544 = vrot.lane.b32.xlu1 %v543_v17, %s1014_s28  ;;  %619 = vrot.lane.b32.xlu0 %v543_v17, %s1015_s15 }
 0x10f   : > { %v520_v18 = vpop.permute.xlu0 %519 }
 0x110   : > { %v526_v19 = vsel %vm521_vm1, %v520_v18, 0 }
 0x111   : > { %535 = vmatpush.bf16.xpose.msra.mxu1 %v526_v19 }
 0x117   : > { %v598_v22 = vpop.permute.xlu0 %597 }
 0x118   : > { %919 = vmatmul.msk.bf16.vlgmr.msra.gmra.mxu1 %vm521_vm1, %v512_v21  ;;  %v604_v23 = vsel %vm602_vm2, %v598_v22, 0 }
 0x119   : > { %613 = vmatpush.bf16.msra.mxu3 %v604_v23  ;;  %v964_v23 = vld [vmem:[%s1202_s8] sm:$0xff] }
 0x180   : > { %v545_v24 = vpop.permute.xlu1 %544  ;;  %v620_v25 = vpop.permute.xlu0 %619 }
 0x181   : > { %v550_v26 = vsel %vm521_vm1, %v545_v24, 0  ;;  %v625_v27 = vsel %vm602_vm2, %v620_v25, 0  ;;  %v969_v24 = vld [vmem:[%s1204_s10 + $0x18] sm:$0xff] }
 0x182   : > { %559 = vmatpush.bf16.xpose.msra.mxu2 %v550_v26  ;;  %634 = vmatpush.bf16.msrb.mxu3 %v625_v27  ;;  %v968_v27 = vld [vmem:[%s1204_s10 + $0x10] sm:$0xff] }
 0x189   : > { %920 = vmatmul.msk.bf16.vlgmr.msra.gmra.mxu2 %vm521_vm1, %v513_v29  ;;  %v967_v29 = vld [vmem:[%s1204_s10 + $0x8] sm:$0xff] }
 0x18a   : > { %805 = vmatpush.bf16.msrb.mxu2 %v969_v24 }
 0x18e   : > { %806 = vmatpush.bf16.msrb.mxu2 %v968_v27 }
 0x192   : > { %807 = vmatpush.bf16.msrb.mxu2 %v967_v29 }
 0x195   : > { %v537_v33 = vpop.f32.mrf.mxu1 }
 0x196   : > { %v570_v34 = vsel %vm569_vm3, %v537_v33, -inf }
 0x197   : > { %v573_v35 = vsel %vm572_vm4, %v570_v34, -inf }
 0x198   : > { %574 = vmax.xlane.f32.xlu1 %v573_v35 }
 0x19d   : > { %v539_v36 = vpop.f32.mrf.mxu1 }
 0x19e   : > { %v985_v36 = vld [vmem:[%s1200_s6] ss:$0 sm:$0xff] }
 0x20b   : > { %v575_v37 = vpop.xlane.xlu1 %574 }
 0x20c   : > { %v579_v38 = vsub.f32 %v570_v34, %v575_v37  ;;  %v561_v39 = vpop.f32.mrf.mxu2 }
 0x20d   : > { %v571_v40 = vsel %vm569_vm3, %v561_v39, -inf  ;;  %v986_v39 = vld [vmem:[%s1201_s7] ss:$0 sm:$0xff] }
 0x20e   : > { %v581_v41 = vmul.f32 1.442695, %v579_v38  ;;  %v576_v42 = vsel %vm572_vm4, %v571_v40, -inf }
 0x20f   : > { %577 = vmax.xlane.f32.xlu2 %v576_v42 }
 0x210   : > { %991 = vpow2.f32 %v581_v41 }
 0x214   : > { %v563_v43 = vpop.f32.mrf.mxu2 }
 0x215   : > { %v966_v43 = vld [vmem:[%s1204_s10] sm:$0xff] }
 0x216   : > { %v992_v44 = vpop.eup %991  ;;  %808 = vmatpush.bf16.msrb.mxu2 %v966_v43 }
 0x217   : > { %v585_v45 = vsel %vm572_vm4, %v992_v44, 0.0 }
 0x218   : > { %586 = vadd.xlane.f32.xlu2 %v585_v45 }
 0x282   : > { %v578_v46 = vpop.xlane.xlu2 %577 }
 0x283   : > { %v580_v47 = vsub.f32 %v571_v40, %v578_v46 }
 0x285   : > { %v583_v48 = vmul.f32 1.442695, %v580_v47 }
 0x287   : > { %993 = vpow2.f32 %v583_v48 }
 0x28b   : > { %v587_v49 = vpop.xlane.xlu2 %586 }
 0x28c   : > { %995 = vrcp.f32 %v587_v49 }
 0x28d   : > { %v994_v50 = vpop.eup %993 }
 0x28e   : > { %v588_v51 = vsel %vm572_vm4, %v994_v50, 0.0 }
 0x28f   : > { %589 = vadd.xlane.f32.xlu2 %v588_v51 }
 0x292   : > { %v996_v52 = vpop.eup %995 }
 0x293   : > { %v593_v53 = vmul.f32 %v996_v52, %v992_v44  ;;  %v987_v44 = vld [vmem:[%s1203_s9] ss:$0 sm:$0xff] }
 0x295   : > { %v595_v54 = vpack.c.bf16 %v593_v53, %v593_v53 }
 0x297   : > { %921 = vmatmul.msk.bf16.vlgmr.msra.gmra.mxu3 %vm572_vm4, %v595_v54 }
 0x302   : > { %v590_v55 = vpop.xlane.xlu2 %589 }
 0x303   : > { %997 = vrcp.f32 %v590_v55 }
 0x304   : > { %999 = vrcp.f32 %v1017_v11 }
 0x309   : > { %v998_v56 = vpop.eup %997 }
 0x30a   : > { %v594_v57 = vmul.f32 %v998_v56, %v994_v50  ;;  %v1000_v12 = vpop.eup %999  ;;  %v988_v50 = vld [vmem:[%s1205_s11] ss:$0 sm:$0xff] }
 0x30b   : > { %v687_v13 = vmul.f32 32.0, %v1000_v12  ;;  %vm691_vm5 = vweird.f32 %v1000_v12 }
 0x30c   : > { %v596_v58 = vpack.c.bf16 %v594_v57, %v594_v57 }
 0x30d   : > { %v688_v14 = vsub.f32 1.0, %v687_v13 }
 0x30e   : > { %922 = vmatmul.msk.bf16.vlgmr.msrb.gmra.mxu3 %vm572_vm4, %v596_v58 }
 0x30f   : > { %v689_v15 = vmul.f32 %v1000_v12, %v688_v14 }
 0x311   : > { %v690_v16 = vadd.f32 %v1000_v12, %v689_v15 }
 0x313   : > { %v692_v17 = vsel %vm691_vm5, %v1000_v12, %v690_v16 }
 0x31a   : > { %v615_v59 = vpop.f32.mrf.mxu3 }
 0x322   : > { %v617_v60 = vpop.f32.mrf.mxu3 }
 0x391   : > { %v636_v63 = vpop.f32.mrf.mxu3 }
 0x392   : > { %641 = vrot.lane.b32.xlu2 %v636_v63, %s1016_s20 }
 0x399   : > { %v638_v0 = vpop.f32.mrf.mxu3 }
 0x3ec   : > { %v642_v1 = vpop.permute.xlu2 %641 }
 0x3ed   : > { %v644_v2 = vsel %vm521_vm1, %v615_v59, %v642_v1 }
 0x3ee   : > { %v645_v3 = vpack.c.bf16 %v644_v2, %v644_v2 }
 0x3f0   : > { %931 = vmatmul.msk.bf16.vlgmr.msrb.gmra.mxu0 %vm489_vm0, %v645_v3 }
 0x46d   : > { %v678_v6 = vpop.f32.mrf.mxu0 }
 0x46e   : > { %v679_v7 = vadd.f32 %v984_v4, %v678_v6 }
 0x470   : > { %v682_v8 = vadd.f32 %v679_v7, %v1116_v5  ;;  %v965_v5 = vld [vmem:[%s1202_s8 + $0x8] sm:$0xff]  ;;  %v989_v7 = vld [vmem:[%s1206_s12] ss:$0 sm:$0xff] }
 0x471   : > { %752 = vmatpush.bf16.msrb.mxu1 %v965_v5 }
 0x472   : > { %v683_v9 = vsel %vm489_vm0, %v682_v8, 0.0 }
 0x473   : > { %684 = vadd.xlane.f32.xlu0 %v683_v9  ;;  %v990_v9 = vld [vmem:[%s1207_s13] ss:$0 sm:$0xff] }
 0x475   : > { %v680_v10 = vpop.f32.mrf.mxu0  ;;  %753 = vmatpush.bf16.msrb.mxu1 %v964_v23 }
 0x4e6   : > { %v685_v18 = vpop.xlane.xlu0 %684 }
 0x4e7   : > { %v693_v19 = vmul.f32 %v692_v17, %v685_v18 }
 0x4e9   : > { %v694_v20 = vsub.f32 %v682_v8, %v693_v19 }
 0x4eb   : > { %v695_v21 = vmul.f32 %v694_v20, %v694_v20 }
 0x4ed   : > { %v696_v22 = vsel %vm489_vm0, %v695_v21, 0.0 }
 0x4ee   : > { %697 = vadd.xlane.f32.xlu2 %v696_v22 }
 0x561   : > { %v698_v25 = vpop.xlane.xlu2 %697 }
 0x562   : > { %v699_v26 = vmul.f32 %v698_v25, %v692_v17 }
 0x564   : > { %v700_v28 = vadd.f32 1e-05, %v699_v26 }
 0x566   : > { %1001 = vrsqrt.f32 %v700_v28  ;;  %vm707_vm7 = vweird.f32 %v700_v28 }
 0x56c   : > { %v1002_v30 = vpop.eup %1001 }
 0x56d   : > { %v702_v31 = vmul.f32 %v1002_v30, %v700_v28  ;;  %vm708_vm6 = vweird.f32 %v1002_v30 }
 0x56e   : > { %vm709_vm8 = vmor %vm707_vm7, %vm708_vm6 }
 0x56f   : > { %v703_v32 = vmul.f32 %v1002_v30, %v702_v31 }
 0x571   : > { %v704_v33 = vmul.f32 0.5, %v703_v32 }
 0x573   : > { %v705_v34 = vsub.f32 1.5, %v704_v33 }
 0x575   : > { %v706_v35 = vmul.f32 %v1002_v30, %v705_v34 }
 0x577   : > { %v710_v37 = vsel %vm709_vm8, %v1002_v30, %v706_v35 }
 0x578   : > { %v711_v38 = vmul.f32 %v710_v37, %v694_v20 }
 0x57a   : > { %v716_v40 = vmul.f32 %v985_v36, %v711_v38 }
 0x57c   : > { %v721_v41 = vadd.f32 %v986_v39, %v716_v40 }
 0x57e   : > { %v722_v42 = vpack.c.bf16 %v721_v41, %v721_v41 }
 0x580   : > { %940 = vmatmul.msk.bf16.vlgmr.msrb.gmra.mxu1 %vm489_vm0, %v722_v42 }
 0x5fd   : > { %v755_v45 = vpop.f32.mrf.mxu1 }
 0x5fe   : > { %v756_v46 = vadd.f32 %v987_v44, %v755_v45 }
 0x600   : > { %v759_v47 = vmax.f32 %v756_v46, 0.0 }
 0x602   : > { %v760_v48 = vpack.c.bf16 %v759_v47, %v759_v47 }
 0x604   : > { %957 = vmatmul.msk.bf16.vlgmr.msrb.gmra.mxu2 %vm797_vm9, %v760_v48 }
 0x605   : > { %v757_v49 = vpop.f32.mrf.mxu1 }
 0x687   : > { %v810_v51 = vpop.f32.mrf.mxu2 }
 0x688   : > { %v811_v52 = vadd.f32 %v988_v50, %v810_v51 }
 0x68a   : > { %v814_v53 = vadd.f32 %v811_v52, %v721_v41 }
 0x68c   : > { %v815_v54 = vsel %vm489_vm0, %v814_v53, 0.0 }
 0x68d   : > { %816 = vadd.xlane.f32.xlu1 %v815_v54 }
 0x68f   : > { %v812_v55 = vpop.f32.mrf.mxu2 }
 0x700   : > { %v817_v56 = vpop.xlane.xlu1 %816 }
 0x701   : > { %v818_v57 = vmul.f32 %v817_v56, %v692_v17 }
 0x703   : > { %v819_v58 = vsub.f32 %v814_v53, %v818_v57 }
 0x705   : > { %v820_v59 = vmul.f32 %v819_v58, %v819_v58 }
 0x707   : > { %v821_v60 = vsel %vm489_vm0, %v820_v59, 0.0 }
 0x708   : > { %822 = vadd.xlane.f32.xlu1 %v821_v60 }
 0x77b   : > { %v823_v61 = vpop.xlane.xlu1 %822 }
 0x77c   : > { %v824_v62 = vmul.f32 %v823_v61, %v692_v17 }
 0x77e   : > { %v825_v63 = vadd.f32 1e-05, %v824_v62 }
 0x780   : > { %1003 = vrsqrt.f32 %v825_v63  ;;  %vm832_vm11 = vweird.f32 %v825_v63 }
 0x786   : > { %v1004_v0 = vpop.eup %1003 }
 0x787   : > { %v827_v1 = vmul.f32 %v1004_v0, %v825_v63  ;;  %vm833_vm10 = vweird.f32 %v1004_v0 }
 0x788   : > { %vm834_vm12 = vmor %vm832_vm11, %vm833_vm10 }
 0x789   : > { %v828_v2 = vmul.f32 %v1004_v0, %v827_v1 }
 0x78b   : > { %v829_v3 = vmul.f32 0.5, %v828_v2 }
 0x78d   : > { %v830_v4 = vsub.f32 1.5, %v829_v3 }
 0x78f   : > { %v831_v6 = vmul.f32 %v1004_v0, %v830_v4 }
 0x791   : > { %v835_v8 = vsel %vm834_vm12, %v1004_v0, %v831_v6 }
 0x792   : > { %v836_v10 = vmul.f32 %v835_v8, %v819_v58 }
 0x794   : > { %v841_v11 = vmul.f32 %v989_v7, %v836_v10 }
 0x796   : > { %v846_v12 = vadd.f32 %v990_v9, %v841_v11 }
 0x798   : > { %v847_v13 = vpack.c.bf16 %v846_v12, %v846_v12 }
 0x79a   : > { %849 = vst.msk [vmem:[%s462_s22] sm:$0xf] %vm848_vm13, %v847_v13 }
 0x79b PF: > { %s24_s29 = sadd.s32 1, %s1011_s29  }
 0x79c   : > { %p21_p4 = scmp.ge.s32.totalorder %s24_s29, 4  }
 0x79e   :  { %23 = sbr.rel (!%p21_p4) target bundleno = 1 (0x1), region = 106 }

// kernel: transformer_lm_forward.4
= control target key start
LH: loop header
LB: loop body
LE: loop exit
PB: predicated region body
PF: predicated region fallthrough
CT: control target
= control target key end

     0   :  { %s1090_s28 = smov 0   ;;  %s1190_s0 = inlined_call_operand.vmem [shape: bf16[2,8,32], index: 0, kind: input, shape index: {}]   ;;  %s1191_s1 = inlined_call_operand.vmem [shape: f32[8,32], index: 1, kind: input, shape index: {}]   ;;  %s1192_s2 = inlined_call_operand.vmem [shape: bf16[32,96], index: 2, kind: input, shape index: {}]   ;;  %s1193_s3 = inlined_call_operand.vmem [shape: f32[1,96], index: 3, kind: input, shape index: {}]   ;;  %s1194_s4 = inlined_call_operand.vmem [shape: bf16[32,32], index: 4, kind: input, shape index: {}]   ;;  %s1195_s5 = inlined_call_operand.vmem [shape: f32[1,32], index: 5, kind: input, shape index: {}]   ;;  %s1196_s6 = inlined_call_operand.vmem [shape: f32[1,32], index: 6, kind: input, shape index: {}]   ;;  %s1197_s7 = inlined_call_operand.vmem [shape: f32[1,32], index: 7, kind: input, shape index: {}]   ;;  %s1198_s8 = inlined_call_operand.vmem [shape: bf16[32,64], index: 8, kind: input, shape index: {}]   ;;  %s1199_s9 = inlined_call_operand.vmem [shape: f32[1,64], index: 9, kind: input, shape index: {}]   ;;  %s1200_s10 = inlined_call_operand.vmem [shape: bf16[64,32], index: 10, kind: input, shape index: {}]   ;;  %s1201_s11 = inlined_call_operand.vmem [shape: f32[1,32], index: 11, kind: input, shape index: {}]   ;;  %s1202_s12 = inlined_call_operand.vmem [shape: f32[1,32], index: 12, kind: input, shape index: {}]   ;;  %s1203_s13 = inlined_call_operand.vmem [shape: f32[1,32], index: 13, kind: input, shape index: {}]   ;;  %s1204_s14 = inlined_call_operand.vmem [shape: bf16[2,8,32], index: 14, kind: output, shape index: {}]  }
   0x1 LB: > { %s900_s29 = sadd.s32 4294967295, %s1008_s28   ;;  %p904_p0 = scmp.ge.s32.totalorder %s1008_s28, 1  ;;  %s1008_s28 = sphi %s1090_s28, %s24_s28  }
   0x2   : > { %p411_p1 = scmp.lt.s32.totalorder %s1008_s28, 3 }
   0x4   : > { %p412_p2 = pnand %p904_p0, %p411_p1 }
   0x5   : > { %p455_p3 = scmp.lt.s32.totalorder (!%p412_p2), %s900_s29, 1  ;;  %s1010_s23 = smov (!%p412_p2), 112  }
   0x6   : > { %415 = sbr.rel (%p412_p2) target bundleno = 1945 (0x799), region = 76  ;;  %s1011_s24 = smov (!%p412_p2), 96  }
   0x7   : > { %s1012_s25 = smov (!%p412_p2), 64   ;;  %s1013_s1 = smov (!%p412_p2), 16  }
   0xb   : > { %v958_v0 = vld [vmem:[%s1192_s2 + $0x8] sm:$0xff]  ;;  %v957_v1 = vld [vmem:[%s1192_s2] sm:$0xff]  ;;  %s1206_s29 = smov (!%p455_p3, %s900_s29), 1  ;;  %vm486_vm0 = vcmask 261120   ;;  %vm518_vm1 = vcmask 130048   ;;  %vm599_vm2 = vcmask 1043456   ;;  %v562_v26 = vlaneseq }
   0xc   : > { %496 = vmatpush.bf16.msra.mxu0 %v958_v0  ;;  %s905_s17 = sshll.u32 %s1206_s29, 2  ;;  %v980_v3 = vld [vmem:[%s1193_s3] ss:$0 sm:$0xff]  ;;  %vm569_vm4 = vcmask 64512   ;;  %v960_v57 = vld [vmem:[%s1194_s4 + $0x8] sm:$0xff]  ;;  %vm794_vm9 = vcmask 523264  }
   0xd   : > { %s458_s20 = scalar_lea.vmem %s1190_s0, %s905_s17  ;;  %v563_v27 = vshrl.u32 %v562_v26, 7  ;;  %v565_v28 = vand.u32 127, %v562_v26  ;;  %v959_v58 = vld [vmem:[%s1194_s4] sm:$0xff]  ;;  %v964_v26 = vld [vmem:[%s1200_s10 + $0x8] sm:$0xff]  ;;  %s462_s16 = scalar_lea.vmem %s1204_s14, %s905_s17  ;;  %vm845_vm13 = vcmask 257024  }
   0xe   : > { %v1112_v2 = vld [vmem:[%s458_s20] sm:$0xf] }
   0xf   : > { %vm566_vm3 = vcmp.le.s32.totalorder %v565_v28, %v563_v27  ;;  %v981_v0 = vld [vmem:[%s1195_s5] ss:$0 sm:$0xff] }
  0x10   : > { %497 = vmatpush.bf16.msra.mxu0 %v957_v1  ;;  %v465_v1 = vunpack.c.l.bf16 %v1112_v2 }
  0x13   : > { %915 = vmatmul.msk.bf16.vlgmr.msra.gmra.mxu0 %vm486_vm0, %v1112_v2 }
  0x14   : > { %672 = vmatpush.bf16.msrb.mxu0 %v960_v57 }
  0x18   : > { %673 = vmatpush.bf16.msrb.mxu0 %v959_v58 }
  0x90   : > { %v499_v4 = vpop.f32.mrf.mxu0 }
  0x91   : > { %v500_v5 = vadd.f32 %v980_v3, %v499_v4 }
  0x93   : > { %504 = vrot.lane.b32.xlu0 %v500_v5, %s1010_s23  ;;  %v511_v6 = vpack.c.bf16 %v500_v5, %v500_v5  ;;  %v507_v16 = vmul.f32 0.25, %v500_v5 }
  0x95   : > { %v514_v7 = vunpack.c.l.b16 %v511_v6  ;;  %v509_v17 = vpack.c.bf16 %v507_v16, %v507_v16 }
  0x97   : > { %v515_v9 = vpack.c.b16 %v514_v7, %v514_v7 }
  0x98   : > { %v501_v8 = vpop.f32.mrf.mxu0 }
  0x99   : > { %v1014_v8 = vmov 32.0  }
  0x9b   : > { %516 = vrot.lane.b32.xlu0 %v515_v9, %s1011_s24 }
  0xa3   : > { %594 = vrot.lane.b32.xlu0 %v515_v9, %s1012_s25 }
 0x105   : > { %v505_v10 = vpop.permute.xlu0 %504 }
 0x106   : > { %v512_v11 = vpack.c.bf16 %v505_v10, %v505_v10  ;;  %v508_v24 = vmul.f32 0.25, %v505_v10 }
 0x108   : > { %v539_v12 = vunpack.c.l.b16 %v512_v11  ;;  %v510_v25 = vpack.c.bf16 %v508_v24, %v508_v24  ;;  %v965_v24 = vld [vmem:[%s1200_s10 + $0x10] sm:$0xff] }
 0x10a   : > { %v540_v13 = vpack.c.b16 %v539_v12, %v539_v12 }
 0x10c   : > { %541 = vrot.lane.b32.xlu1 %v540_v13, %s1011_s24  ;;  %616 = vrot.lane.b32.xlu0 %v540_v13, %s1012_s25 }
 0x10d   : > { %v517_v14 = vpop.permute.xlu0 %516 }
 0x10e   : > { %v523_v15 = vsel %vm518_vm1, %v517_v14, 0 }
 0x10f   : > { %532 = vmatpush.bf16.xpose.msra.mxu1 %v523_v15 }
 0x115   : > { %v595_v18 = vpop.permute.xlu0 %594 }
 0x116   : > { %916 = vmatmul.msk.bf16.vlgmr.msra.gmra.mxu1 %vm518_vm1, %v509_v17  ;;  %v601_v19 = vsel %vm599_vm2, %v595_v18, 0 }
 0x117   : > { %610 = vmatpush.bf16.msra.mxu3 %v601_v19  ;;  %v962_v19 = vld [vmem:[%s1198_s8 + $0x8] sm:$0xff] }
 0x118   : > { %749 = vmatpush.bf16.msrb.mxu1 %v962_v19 }
 0x17e   : > { %v542_v20 = vpop.permute.xlu1 %541  ;;  %v617_v21 = vpop.permute.xlu0 %616 }
 0x17f   : > { %v547_v22 = vsel %vm518_vm1, %v542_v20, 0  ;;  %v622_v23 = vsel %vm599_vm2, %v617_v21, 0  ;;  %v961_v20 = vld [vmem:[%s1198_s8] sm:$0xff]  ;;  %v966_v21 = vld [vmem:[%s1200_s10 + $0x18] sm:$0xff] }
 0x180   : > { %556 = vmatpush.bf16.xpose.msra.mxu2 %v547_v22  ;;  %631 = vmatpush.bf16.msrb.mxu3 %v622_v23 }
 0x181   : > { %750 = vmatpush.bf16.msrb.mxu1 %v961_v20 }
 0x187   : > { %917 = vmatmul.msk.bf16.vlgmr.msra.gmra.mxu2 %vm518_vm1, %v510_v25 }
 0x188   : > { %802 = vmatpush.bf16.msrb.mxu2 %v966_v21 }
 0x18c   : > { %803 = vmatpush.bf16.msrb.mxu2 %v965_v24 }
 0x190   : > { %804 = vmatpush.bf16.msrb.mxu2 %v964_v26 }
 0x193   : > { %v534_v29 = vpop.f32.mrf.mxu1 }
 0x194   : > { %v567_v30 = vsel %vm566_vm3, %v534_v29, -inf }
 0x195   : > { %v570_v31 = vsel %vm569_vm4, %v567_v30, -inf }
 0x196   : > { %571 = vmax.xlane.f32.xlu1 %v570_v31 }
 0x19b   : > { %v536_v32 = vpop.f32.mrf.mxu1 }
 0x209   : > { %v572_v33 = vpop.xlane.xlu1 %571 }
 0x20a   : > { %v576_v34 = vsub.f32 %v567_v30, %v572_v33  ;;  %v558_v35 = vpop.f32.mrf.mxu2  ;;  %v982_v33 = vld [vmem:[%s1196_s6] ss:$0 sm:$0xff] }
 0x20b   : > { %v568_v36 = vsel %vm566_vm3, %v558_v35, -inf }
 0x20c   : > { %v578_v37 = vmul.f32 1.442695, %v576_v34  ;;  %v573_v38 = vsel %vm569_vm4, %v568_v36, -inf }
 0x20d   : > { %574 = vmax.xlane.f32.xlu2 %v573_v38 }
 0x20e   : > { %988 = vpow2.f32 %v578_v37 }
 0x212   : > { %v560_v39 = vpop.f32.mrf.mxu2 }
 0x214   : > { %v989_v40 = vpop.eup %988 }
 0x215   : > { %v582_v41 = vsel %vm569_vm4, %v989_v40, 0.0 }
 0x216   : > { %583 = vadd.xlane.f32.xlu2 %v582_v41  ;;  %v984_v41 = vld [vmem:[%s1199_s9] ss:$0 sm:$0xff] }
 0x280   : > { %v575_v42 = vpop.xlane.xlu2 %574 }
 0x281   : > { %v577_v43 = vsub.f32 %v568_v36, %v575_v42  ;;  %v983_v36 = vld [vmem:[%s1197_s7] ss:$0 sm:$0xff] }
 0x283   : > { %v580_v44 = vmul.f32 1.442695, %v577_v43 }
 0x285   : > { %990 = vpow2.f32 %v580_v44 }
 0x289   : > { %v584_v45 = vpop.xlane.xlu2 %583 }
 0x28a   : > { %992 = vrcp.f32 %v584_v45 }
 0x28b   : > { %v991_v46 = vpop.eup %990 }
 0x28c   : > { %v585_v47 = vsel %vm569_vm4, %v991_v46, 0.0 }
 0x28d   : > { %586 = vadd.xlane.f32.xlu2 %v585_v47  ;;  %v985_v47 = vld [vmem:[%s1201_s11] ss:$0 sm:$0xff] }
 0x290   : > { %v993_v48 = vpop.eup %992 }
 0x291   : > { %v590_v49 = vmul.f32 %v993_v48, %v989_v40  ;;  %v963_v40 = vld [vmem:[%s1200_s10] sm:$0xff] }
 0x292   : > { %805 = vmatpush.bf16.msrb.mxu2 %v963_v40 }
 0x293   : > { %v592_v50 = vpack.c.bf16 %v590_v49, %v590_v49 }
 0x295   : > { %918 = vmatmul.msk.bf16.vlgmr.msra.gmra.mxu3 %vm569_vm4, %v592_v50 }
 0x300   : > { %v587_v51 = vpop.xlane.xlu2 %586 }
 0x301   : > { %994 = vrcp.f32 %v587_v51 }
 0x302   : > { %996 = vrcp.f32 %v1014_v8 }
 0x307   : > { %v995_v52 = vpop.eup %994 }
 0x308   : > { %v591_v53 = vmul.f32 %v995_v52, %v991_v46  ;;  %v997_v9 = vpop.eup %996 }
 0x309   : > { %v684_v10 = vmul.f32 32.0, %v997_v9  ;;  %vm688_vm5 = vweird.f32 %v997_v9 }
 0x30a   : > { %v593_v54 = vpack.c.bf16 %v591_v53, %v591_v53 }
 0x30b   : > { %v685_v11 = vsub.f32 1.0, %v684_v10 }
 0x30c   : > { %919 = vmatmul.msk.bf16.vlgmr.msrb.gmra.mxu3 %vm569_vm4, %v593_v54 }
 0x30d   : > { %v686_v12 = vmul.f32 %v997_v9, %v685_v11 }
 0x30f   : > { %v687_v13 = vadd.f32 %v997_v9, %v686_v12 }
 0x311   : > { %v689_v14 = vsel %vm688_vm5, %v997_v9, %v687_v13 }
 0x318   : > { %v612_v55 = vpop.f32.mrf.mxu3 }
 0x320   : > { %v614_v56 = vpop.f32.mrf.mxu3 }
 0x38f   : > { %v633_v59 = vpop.f32.mrf.mxu3 }
 0x390   : > { %638 = vrot.lane.b32.xlu2 %v633_v59, %s1013_s1 }
 0x397   : > { %v635_v60 = vpop.f32.mrf.mxu3 }
 0x3ea   : > { %v639_v61 = vpop.permute.xlu2 %638 }
 0x3eb   : > { %v641_v62 = vsel %vm518_vm1, %v612_v55, %v639_v61 }
 0x3ec   : > { %v642_v63 = vpack.c.bf16 %v641_v62, %v641_v62 }
 0x3ee   : > { %928 = vmatmul.msk.bf16.vlgmr.msrb.gmra.mxu0 %vm486_vm0, %v642_v63 }
 0x46b   : > { %v675_v3 = vpop.f32.mrf.mxu0 }
 0x46c   : > { %v676_v4 = vadd.f32 %v981_v0, %v675_v3 }
 0x46e   : > { %v679_v5 = vadd.f32 %v676_v4, %v465_v1  ;;  %v986_v4 = vld [vmem:[%s1202_s12] ss:$0 sm:$0xff] }
 0x470   : > { %v680_v6 = vsel %vm486_vm0, %v679_v5, 0.0 }
 0x471   : > { %681 = vadd.xlane.f32.xlu0 %v680_v6  ;;  %v987_v6 = vld [vmem:[%s1203_s13] ss:$0 sm:$0xff] }
 0x473   : > { %v677_v7 = vpop.f32.mrf.mxu0 }
 0x4e4   : > { %v682_v15 = vpop.xlane.xlu0 %681 }
 0x4e5   : > { %v690_v16 = vmul.f32 %v689_v14, %v682_v15 }
 0x4e7   : > { %v691_v17 = vsub.f32 %v679_v5, %v690_v16 }
 0x4e9   : > { %v692_v2 = vmul.f32 %v691_v17, %v691_v17 }
 0x4eb   : > { %v693_v18 = vsel %vm486_vm0, %v692_v2, 0.0 }
 0x4ec   : > { %694 = vadd.xlane.f32.xlu2 %v693_v18 }
 0x55f   : > { %v695_v22 = vpop.xlane.xlu2 %694 }
 0x560   : > { %v696_v23 = vmul.f32 %v695_v22, %v689_v14 }
 0x562   : > { %v697_v25 = vadd.f32 1e-05, %v696_v23 }
 0x564   : > { %998 = vrsqrt.f32 %v697_v25  ;;  %vm704_vm7 = vweird.f32 %v697_v25 }
 0x56a   : > { %v999_v27 = vpop.eup %998 }
 0x56b   : > { %v699_v28 = vmul.f32 %v999_v27, %v697_v25  ;;  %vm705_vm6 = vweird.f32 %v999_v27 }
 0x56c   : > { %vm706_vm8 = vmor %vm704_vm7, %vm705_vm6 }
 0x56d   : > { %v700_v29 = vmul.f32 %v999_v27, %v699_v28 }
 0x56f   : > { %v701_v30 = vmul.f32 0.5, %v700_v29 }
 0x571   : > { %v702_v31 = vsub.f32 1.5, %v701_v30 }
 0x573   : > { %v703_v32 = vmul.f32 %v999_v27, %v702_v31 }
 0x575   : > { %v707_v34 = vsel %vm706_vm8, %v999_v27, %v703_v32 }
 0x576   : > { %v708_v35 = vmul.f32 %v707_v34, %v691_v17 }
 0x578   : > { %v713_v37 = vmul.f32 %v982_v33, %v708_v35 }
 0x57a   : > { %v718_v38 = vadd.f32 %v983_v36, %v713_v37 }
 0x57c   : > { %v719_v39 = vpack.c.bf16 %v718_v38, %v718_v38 }
 0x57e   : > { %937 = vmatmul.msk.bf16.vlgmr.msrb.gmra.mxu1 %vm486_vm0, %v719_v39 }
 0x5fb   : > { %v752_v42 = vpop.f32.mrf.mxu1 }
 0x5fc   : > { %v753_v43 = vadd.f32 %v984_v41, %v752_v42 }
 0x5fe   : > { %v756_v44 = vmax.f32 %v753_v43, 0.0 }
 0x600   : > { %v757_v45 = vpack.c.bf16 %v756_v44, %v756_v44 }
 0x602   : > { %954 = vmatmul.msk.bf16.vlgmr.msrb.gmra.mxu2 %vm794_vm9, %v757_v45 }
 0x603   : > { %v754_v46 = vpop.f32.mrf.mxu1 }
 0x685   : > { %v807_v48 = vpop.f32.mrf.mxu2 }
 0x686   : > { %v808_v49 = vadd.f32 %v985_v47, %v807_v48 }
 0x688   : > { %v811_v50 = vadd.f32 %v808_v49, %v718_v38 }
 0x68a   : > { %v812_v51 = vsel %vm486_vm0, %v811_v50, 0.0 }
 0x68b   : > { %813 = vadd.xlane.f32.xlu1 %v812_v51 }
 0x68d   : > { %v809_v52 = vpop.f32.mrf.mxu2 }
 0x6fe   : > { %v814_v53 = vpop.xlane.xlu1 %813 }
 0x6ff   : > { %v815_v54 = vmul.f32 %v814_v53, %v689_v14 }
 0x701   : > { %v816_v55 = vsub.f32 %v811_v50, %v815_v54 }
 0x703   : > { %v817_v56 = vmul.f32 %v816_v55, %v816_v55 }
 0x705   : > { %v818_v57 = vsel %vm486_vm0, %v817_v56, 0.0 }
 0x706   : > { %819 = vadd.xlane.f32.xlu1 %v818_v57 }
 0x779   : > { %v820_v58 = vpop.xlane.xlu1 %819 }
 0x77a   : > { %v821_v59 = vmul.f32 %v820_v58, %v689_v14 }
 0x77c   : > { %v822_v60 = vadd.f32 1e-05, %v821_v59 }
 0x77e   : > { %1000 = vrsqrt.f32 %v822_v60  ;;  %vm829_vm11 = vweird.f32 %v822_v60 }
 0x784   : > { %v1001_v61 = vpop.eup %1000 }
 0x785   : > { %v824_v62 = vmul.f32 %v1001_v61, %v822_v60  ;;  %vm830_vm10 = vweird.f32 %v1001_v61 }
 0x786   : > { %vm831_vm12 = vmor %vm829_vm11, %vm830_vm10 }
 0x787   : > { %v825_v63 = vmul.f32 %v1001_v61, %v824_v62 }
 0x789   : > { %v826_v0 = vmul.f32 0.5, %v825_v63 }
 0x78b   : > { %v827_v1 = vsub.f32 1.5, %v826_v0 }
 0x78d   : > { %v828_v3 = vmul.f32 %v1001_v61, %v827_v1 }
 0x78f   : > { %v832_v5 = vsel %vm831_vm12, %v1001_v61, %v828_v3 }
 0x790   : > { %v833_v7 = vmul.f32 %v832_v5, %v816_v55 }
 0x792   : > { %v838_v8 = vmul.f32 %v986_v4, %v833_v7 }
 0x794   : > { %v843_v9 = vadd.f32 %v987_v6, %v838_v8 }
 0x796   : > { %v844_v10 = vpack.c.bf16 %v843_v9, %v843_v9 }
 0x798   : > { %846 = vst.msk [vmem:[%s462_s16] sm:$0xf] %vm845_vm13, %v844_v10 }
 0x799 PF: > { %s24_s28 = sadd.s32 1, %s1008_s28  }
 0x79a   : > { %p21_p4 = scmp.ge.s32.totalorder %s24_s28, 4  }
 0x79c   :  { %23 = sbr.rel (!%p21_p4) target bundleno = 1 (0x1), region = 106 }

</bundles_post_ra>
